<compile_context>
chip_gen: v5e
topology: v5e:2x2
jax: 0.10.0
libtpu: 0.0.40
codegen_flags: <defaults>
</compile_context>

<pallas_src>
import functools
import math

import jax
import jax.numpy as jnp
from jax.experimental import pallas as pl
from jax.experimental.pallas import tpu as pltpu

OUT_PAD = 128                  # lane-dense padded width of the classify-head output
MM_DTYPE = jnp.bfloat16        # matmul-operand dtype (f32 accumulation everywhere)

PARAM_ORDER = (
    'ln1_g', 'ln1_b', 'wq', 'bq', 'wk', 'bk', 'wv', 'bv', 'wo', 'bo',
    'ln2_g', 'ln2_b', 'w1', 'b1', 'w2', 'b2',
    'head_w1', 'head_b1', 'head_w2', 'head_b2',
)


# --------------------------------------------------------------------------
# Fused kernel: one grid step = one batch element, all layers + classify head
# --------------------------------------------------------------------------

def _encoder_cls_kernel(
    src_ref, pos_ref,
    ln1g_ref, ln1b_ref, wq_ref, bq_ref, wk_ref, bk_ref, wv_ref, bv_ref,
    wo_ref, bo_ref, ln2g_ref, ln2b_ref, w1_ref, b1_ref, w2_ref, b2_ref,
    hw1_ref, hb1_ref, hw2_ref, hb2_ref,
    out_ref,
    *, num_layers, nhead, eps):
  D = src_ref.shape[-1]
  dh = D // nhead

  x = src_ref[0].astype(jnp.float32)      # (S, D) residual stream, f32
  pos = pos_ref[...].astype(jnp.float32)  # (S, D)

  def layer_norm(v, g, b):
    # one-pass stats: the two reductions are independent and can co-issue
    mu = jnp.mean(v, axis=-1, keepdims=True)
    msq = jnp.mean(v * v, axis=-1, keepdims=True)
    var = msq - mu * mu
    return (v - mu) * jax.lax.rsqrt(var + eps) * g + b

  def mm(a, w, bias):
    # bf16 operands, f32 accumulation, f32 bias add
    return jnp.dot(a.astype(w.dtype), w,
                   preferred_element_type=jnp.float32) + bias

  # TODO(synk): switch to lax.fori_loop + a layer-streaming grid axis at L >= 6
  for l in range(num_layers):
    # ---------------- self-attention block (pre-norm) ----------------
    x2 = layer_norm(x, ln1g_ref[l], ln1b_ref[l])
    qk_in = x2 + pos
    q = mm(qk_in, wq_ref[l], bq_ref[l])   # 1/sqrt(dh) pre-folded into wq/bq
    k = mm(qk_in, wk_ref[l], bk_ref[l])
    v = mm(x2, wv_ref[l], bv_ref[l])

    qb = q.astype(MM_DTYPE)
    kb = k.astype(MM_DTYPE)
    vb = v.astype(MM_DTYPE)

    # per-head attention: outputs stay in vregs, merged with one lane-axis
    # concatenate (no scratch buffer, no masked partial stores).
    heads = []
    for h in range(nhead):
      c0 = h * dh
      qh = qb[:, c0:c0 + dh]
      kh = kb[:, c0:c0 + dh]
      vh = vb[:, c0:c0 + dh]
      s = jax.lax.dot_general(qh, kh, (((1,), (1,)), ((), ())),
                              preferred_element_type=jnp.float32)     # (S, S)
      m = jnp.max(s, axis=-1, keepdims=True)
      p = jnp.exp(s - m)
      denom = jnp.sum(p, axis=-1, keepdims=True)
      p = p * pl.reciprocal(denom, approx=True)
      heads.append(jnp.dot(p.astype(MM_DTYPE), vh,
                           preferred_element_type=jnp.float32))       # (S, dh)
    attn = jnp.concatenate(heads, axis=-1)                            # (S, D)

    x = x + mm(attn, wo_ref[l], bo_ref[l])

    # ---------------- feed-forward block (pre-norm) -------------------
    x2 = layer_norm(x, ln2g_ref[l], ln2b_ref[l])
    hmid = jnp.maximum(mm(x2, w1_ref[l], b1_ref[l]), 0.0)
    x = x + mm(hmid, w2_ref[l], b2_ref[l])

  # ---------------- classify head (lane-dense padded output) ------------
  hh = jnp.maximum(mm(x, hw1_ref[...], hb1_ref[0]), 0.0)
  out = mm(hh, hw2_ref[...], hb2_ref[0])
  out_ref[0] = out.astype(out_ref.dtype)          # (S, 128) lane-dense store


# --------------------------------------------------------------------------
# Position embedding
# --------------------------------------------------------------------------

def sine_pos_embed(seq_len, d_model, dtype=jnp.float32):
  # TODO(synk): exact PositionEmbeddingSine source not provided; using the
  # standard 1-D sinusoidal embedding (sin on even dims, cos on odd dims).
  position = jnp.arange(seq_len, dtype=jnp.float32)[:, None]
  div = jnp.exp(jnp.arange(0, d_model, 2, dtype=jnp.float32)
                * (-math.log(10000.0) / d_model))
  pe = jnp.zeros((seq_len, d_model), dtype=jnp.float32)
  pe = pe.at[:, 0::2].set(jnp.sin(position * div))
  pe = pe.at[:, 1::2].set(jnp.cos(position * div))
  return pe.astype(dtype)


# --------------------------------------------------------------------------
# Wrapper
# --------------------------------------------------------------------------

def _const_spec(shape):
  nd = len(shape)
  return pl.BlockSpec(tuple(shape), lambda b: (0,) * nd)


def transformer_encoder_cls_forward(src, packed, *, nhead, num_cls):
  B, S, D = src.shape
  L = packed['wq'].shape[0]
  pos = sine_pos_embed(S, D, jnp.float32)

  kernel = functools.partial(
      _encoder_cls_kernel, num_layers=L, nhead=nhead, eps=1e-5)

  params = [packed[k] for k in PARAM_ORDER]

  in_specs = [
      pl.BlockSpec((1, S, D), lambda b: (b, 0, 0)),       # src: one batch/step
      _const_spec((S, D)),                                # pos: resident
  ] + [_const_spec(p.shape) for p in params]              # weights: resident
  out_specs = pl.BlockSpec((1, S, OUT_PAD), lambda b: (b, 0, 0))

  # vmem limit sized from the actual resident footprint (double-buffered) + margin
  def _nbytes(a):
    return int(a.size) * jnp.dtype(a.dtype).itemsize
  resident = sum(_nbytes(p) for p in params) + S * D * 4
  blocks = S * D * 4 + S * OUT_PAD * 4
  vmem_limit = min(64 << 20, 2 * (resident + blocks) + (16 << 20))

  out_pad = pl.pallas_call(
      kernel,
      out_shape=jax.ShapeDtypeStruct((B, S, OUT_PAD), jnp.float32),
      grid_spec=pltpu.PrefetchScalarGridSpec(
          num_scalar_prefetch=0,
          grid=(B,),
          in_specs=in_specs,
          out_specs=out_specs),
      compiler_params=pltpu.CompilerParams(
          dimension_semantics=("parallel",),      # batch-parallel (2 TCs on v7x)
          vmem_limit_bytes=int(vmem_limit)),
  )(src, pos, *params)

  return out_pad[:, :, :num_cls]


# --------------------------------------------------------------------------
# Parameter handling: raw (PyTorch-faithful, f32) -> packed (kernel-ready)
# --------------------------------------------------------------------------

def init_raw_params(key, d_model, nhead, dff, num_layers, num_cls):
  D, F, L = d_model, dff, num_layers

  def w(k, shape, s=0.02):
    return s * jax.random.normal(k, shape, dtype=jnp.float32)

  ks = jax.random.split(key, 18)
  return dict(
      ln1_g=jnp.ones((L, D), jnp.float32),
      ln1_b=w(ks[0], (L, D), 0.01),
      wq=w(ks[1], (L, D, D)), bq=w(ks[2], (L, D), 0.01),
      wk=w(ks[3], (L, D, D)), bk=w(ks[4], (L, D), 0.01),
      wv=w(ks[5], (L, D, D)), bv=w(ks[6], (L, D), 0.01),
      wo=w(ks[7], (L, D, D)), bo=w(ks[8], (L, D), 0.01),
      ln2_g=jnp.ones((L, D), jnp.float32),
      ln2_b=w(ks[9], (L, D), 0.01),
      w1=w(ks[10], (L, D, F)), b1=w(ks[11], (L, F), 0.01),
      w2=w(ks[12], (L, F, D)), b2=w(ks[13], (L, D), 0.01),
      head_w1=w(ks[14], (D, 2 * D)), head_b1=w(ks[15], (2 * D,), 0.01),
      head_w2=w(ks[16], (2 * D, num_cls)), head_b2=w(ks[17], (num_cls,), 0.01),
  )


def pack_params(raw, *, nhead, num_cls, mm_dtype=MM_DTYPE):
  """One-time offline transform: fold 1/sqrt(dh) into Wq/bq, cast matmul
  operands to bf16, lane-pad the classify head to OUT_PAD columns."""
  D = raw['wq'].shape[-1]
  scale = 1.0 / math.sqrt(D // nhead)

  p = {}
  p['ln1_g'], p['ln1_b'] = raw['ln1_g'], raw['ln1_b']
  p['wq'] = (raw['wq'] * scale).astype(mm_dtype)
  p['bq'] = raw['bq'] * scale
  p['wk'] = raw['wk'].astype(mm_dtype); p['bk'] = raw['bk']
  p['wv'] = raw['wv'].astype(mm_dtype); p['bv'] = raw['bv']
  p['wo'] = raw['wo'].astype(mm_dtype); p['bo'] = raw['bo']
  p['ln2_g'], p['ln2_b'] = raw['ln2_g'], raw['ln2_b']
  p['w1'] = raw['w1'].astype(mm_dtype); p['b1'] = raw['b1']
  p['w2'] = raw['w2'].astype(mm_dtype); p['b2'] = raw['b2']
  p['head_w1'] = raw['head_w1'].astype(mm_dtype)
  p['head_b1'] = raw['head_b1'][None, :]
  hw2 = jnp.zeros((raw['head_w2'].shape[0], OUT_PAD), jnp.float32)
  hw2 = hw2.at[:, :num_cls].set(raw['head_w2'])
  p['head_w2'] = hw2.astype(mm_dtype)
  hb2 = jnp.zeros((1, OUT_PAD), jnp.float32)
  hb2 = hb2.at[0, :num_cls].set(raw['head_b2'])
  p['head_b2'] = hb2
  return p


# --------------------------------------------------------------------------
# Pure-JAX reference (f32, PyTorch-faithful) for a correctness sanity check
# --------------------------------------------------------------------------

def _reference_forward(src, raw, *, nhead, num_cls):
  B, S, D = src.shape
  H, dh = nhead, D // nhead
  L = raw['wq'].shape[0]
  pos = sine_pos_embed(S, D)[None]
  x = src.astype(jnp.float32)

  def ln(v, g, b):
    mu = v.mean(-1, keepdims=True)
    var = ((v - mu) ** 2).mean(-1, keepdims=True)
    return (v - mu) / jnp.sqrt(var + 1e-5) * g + b

  for l in range(L):
    x2 = ln(x, raw['ln1_g'][l], raw['ln1_b'][l])
    qk_in = x2 + pos
    q = qk_in @ raw['wq'][l] + raw['bq'][l]
    k = qk_in @ raw['wk'][l] + raw['bk'][l]
    v = x2 @ raw['wv'][l] + raw['bv'][l]
    qh = q.reshape(B, S, H, dh).transpose(0, 2, 1, 3)
    kh = k.reshape(B, S, H, dh).transpose(0, 2, 1, 3)
    vh = v.reshape(B, S, H, dh).transpose(0, 2, 1, 3)
    s = jnp.einsum('bhqd,bhkd->bhqk', qh, kh) / math.sqrt(dh)
    p = jax.nn.softmax(s, axis=-1)
    a = jnp.einsum('bhqk,bhkd->bhqd', p, vh).transpose(0, 2, 1, 3).reshape(B, S, D)
    x = x + a @ raw['wo'][l] + raw['bo'][l]
    x2 = ln(x, raw['ln2_g'][l], raw['ln2_b'][l])
    hmid = jax.nn.relu(x2 @ raw['w1'][l] + raw['b1'][l])
    x = x + hmid @ raw['w2'][l] + raw['b2'][l]

  hh = jax.nn.relu(x @ raw['head_w1'] + raw['head_b1'])
  return hh @ raw['head_w2'] + raw['head_b2']


# --------------------------------------------------------------------------

if __name__ == "__main__":
  D_MODEL, NHEAD, DFF, LAYERS, NUM_CLS = 32, 4, 64, 2, 6
  B, S = 2, 8

  key = jax.random.PRNGKey(0)
  pkey, xkey = jax.random.split(key)
  raw = init_raw_params(pkey, D_MODEL, NHEAD, DFF, LAYERS, NUM_CLS)
  packed = pack_params(raw, nhead=NHEAD, num_cls=NUM_CLS)
  src = jax.random.normal(xkey, (B, S, D_MODEL), dtype=jnp.float32)

  fwd = jax.jit(functools.partial(
      transformer_encoder_cls_forward, nhead=NHEAD, num_cls=NUM_CLS))
  out = fwd(src, packed)
  jax.block_until_ready(out)

  assert out.shape == (B, S, NUM_CLS), out.shape
  assert bool(jnp.all(jnp.isfinite(out)))

  ref = _reference_forward(src, raw, nhead=NHEAD, num_cls=NUM_CLS)
  max_err = float(jnp.max(jnp.abs(out - ref)))
  assert max_err < 5e-2, f"mismatch vs reference: {max_err}"

  print("KERNEL_OK")
</pallas_src>

<mosaic_0001>
module attributes {stable_mosaic.version = 11 : i64} {
  func.func @_encoder_cls_kernel(%arg0: i32, %arg1: memref<1x8x32xf32, #tpu.memory_space<vmem>>, %arg2: memref<8x32xf32, #tpu.memory_space<vmem>>, %arg3: memref<2x32xf32, #tpu.memory_space<vmem>>, %arg4: memref<2x32xf32, #tpu.memory_space<vmem>>, %arg5: memref<2x32x32xbf16, #tpu.memory_space<vmem>>, %arg6: memref<2x32xf32, #tpu.memory_space<vmem>>, %arg7: memref<2x32x32xbf16, #tpu.memory_space<vmem>>, %arg8: memref<2x32xf32, #tpu.memory_space<vmem>>, %arg9: memref<2x32x32xbf16, #tpu.memory_space<vmem>>, %arg10: memref<2x32xf32, #tpu.memory_space<vmem>>, %arg11: memref<2x32x32xbf16, #tpu.memory_space<vmem>>, %arg12: memref<2x32xf32, #tpu.memory_space<vmem>>, %arg13: memref<2x32xf32, #tpu.memory_space<vmem>>, %arg14: memref<2x32xf32, #tpu.memory_space<vmem>>, %arg15: memref<2x32x64xbf16, #tpu.memory_space<vmem>>, %arg16: memref<2x64xf32, #tpu.memory_space<vmem>>, %arg17: memref<2x64x32xbf16, #tpu.memory_space<vmem>>, %arg18: memref<2x32xf32, #tpu.memory_space<vmem>>, %arg19: memref<32x64xbf16, #tpu.memory_space<vmem>>, %arg20: memref<1x64xf32, #tpu.memory_space<vmem>>, %arg21: memref<64x128xbf16, #tpu.memory_space<vmem>>, %arg22: memref<1x128xf32, #tpu.memory_space<vmem>>, %arg23: memref<1x8x128xf32, #tpu.memory_space<vmem>>) attributes {dimension_semantics = [#tpu.dimension_semantics<parallel>], iteration_bounds = array<i64: 2>, scalar_prefetch = 0 : i64, scratch_operands = 0 : i64, tpu.core_type = #tpu.core_type<tc>, window_params = [{transform_indices = @transform_0, window_bounds = array<i64: 1, 8, 32>}, {pipeline_mode = #tpu.pipeline_mode<synchronous>, transform_indices = @transform_1, window_bounds = array<i64: 8, 32>}, {pipeline_mode = #tpu.pipeline_mode<synchronous>, transform_indices = @transform_2, window_bounds = array<i64: 2, 32>}, {pipeline_mode = #tpu.pipeline_mode<synchronous>, transform_indices = @transform_3, window_bounds = array<i64: 2, 32>}, {pipeline_mode = #tpu.pipeline_mode<synchronous>, transform_indices = @transform_4, window_bounds = array<i64: 2, 32, 32>}, {pipeline_mode = #tpu.pipeline_mode<synchronous>, transform_indices = @transform_5, window_bounds = array<i64: 2, 32>}, {pipeline_mode = #tpu.pipeline_mode<synchronous>, transform_indices = @transform_6, window_bounds = array<i64: 2, 32, 32>}, {pipeline_mode = #tpu.pipeline_mode<synchronous>, transform_indices = @transform_7, window_bounds = array<i64: 2, 32>}, {pipeline_mode = #tpu.pipeline_mode<synchronous>, transform_indices = @transform_8, window_bounds = array<i64: 2, 32, 32>}, {pipeline_mode = #tpu.pipeline_mode<synchronous>, transform_indices = @transform_9, window_bounds = array<i64: 2, 32>}, {pipeline_mode = #tpu.pipeline_mode<synchronous>, transform_indices = @transform_10, window_bounds = array<i64: 2, 32, 32>}, {pipeline_mode = #tpu.pipeline_mode<synchronous>, transform_indices = @transform_11, window_bounds = array<i64: 2, 32>}, {pipeline_mode = #tpu.pipeline_mode<synchronous>, transform_indices = @transform_12, window_bounds = array<i64: 2, 32>}, {pipeline_mode = #tpu.pipeline_mode<synchronous>, transform_indices = @transform_13, window_bounds = array<i64: 2, 32>}, {pipeline_mode = #tpu.pipeline_mode<synchronous>, transform_indices = @transform_14, window_bounds = array<i64: 2, 32, 64>}, {pipeline_mode = #tpu.pipeline_mode<synchronous>, transform_indices = @transform_15, window_bounds = array<i64: 2, 64>}, {pipeline_mode = #tpu.pipeline_mode<synchronous>, transform_indices = @transform_16, window_bounds = array<i64: 2, 64, 32>}, {pipeline_mode = #tpu.pipeline_mode<synchronous>, transform_indices = @transform_17, window_bounds = array<i64: 2, 32>}, {pipeline_mode = #tpu.pipeline_mode<synchronous>, transform_indices = @transform_18, window_bounds = array<i64: 32, 64>}, {pipeline_mode = #tpu.pipeline_mode<synchronous>, transform_indices = @transform_19, window_bounds = array<i64: 1, 64>}, {pipeline_mode = #tpu.pipeline_mode<synchronous>, transform_indices = @transform_20, window_bounds = array<i64: 64, 128>}, {pipeline_mode = #tpu.pipeline_mode<synchronous>, transform_indices = @transform_21, window_bounds = array<i64: 1, 128>}, {transform_indices = @transform_22, window_bounds = array<i64: 1, 8, 128>}]} {
    %c0 = arith.constant 0 : index
    %c0_0 = arith.constant 0 : index
    %c0_1 = arith.constant 0 : index
    %0 = vector.load %arg1[%c0, %c0_0, %c0_1] : memref<1x8x32xf32, #tpu.memory_space<vmem>>, vector<1x8x32xf32>
    %1 = vector.shape_cast %0 : vector<1x8x32xf32> to vector<8x32xf32>
    %c0_2 = arith.constant 0 : index
    %c0_3 = arith.constant 0 : index
    %2 = vector.load %arg2[%c0_2, %c0_3] : memref<8x32xf32, #tpu.memory_space<vmem>>, vector<8x32xf32>
    %c0_4 = arith.constant 0 : index
    %c0_5 = arith.constant 0 : index
    %3 = vector.load %arg3[%c0_4, %c0_5] : memref<2x32xf32, #tpu.memory_space<vmem>>, vector<1x32xf32>
    %4 = vector.shape_cast %3 : vector<1x32xf32> to vector<32xf32>
    %c0_6 = arith.constant 0 : index
    %c0_7 = arith.constant 0 : index
    %5 = vector.load %arg4[%c0_6, %c0_7] : memref<2x32xf32, #tpu.memory_space<vmem>>, vector<1x32xf32>
    %6 = vector.shape_cast %5 : vector<1x32xf32> to vector<32xf32>
    %cst = arith.constant dense<0.000000e+00> : vector<8xf32>
    %7 = vector.multi_reduction <add>, %1, %cst [1] : vector<8x32xf32> to vector<8xf32>
    %8 = vector.shape_cast %7 : vector<8xf32> to vector<8x1xf32>
    %cst_8 = arith.constant 3.200000e+01 : f32
    %9 = vector.broadcast %cst_8 : f32 to vector<8x1xf32>
    %10 = arith.divf %8, %9 : vector<8x1xf32>
    %11 = arith.mulf %1, %1 : vector<8x32xf32>
    %cst_9 = arith.constant dense<0.000000e+00> : vector<8xf32>
    %12 = vector.multi_reduction <add>, %11, %cst_9 [1] : vector<8x32xf32> to vector<8xf32>
    %13 = vector.shape_cast %12 : vector<8xf32> to vector<8x1xf32>
    %cst_10 = arith.constant 3.200000e+01 : f32
    %14 = vector.broadcast %cst_10 : f32 to vector<8x1xf32>
    %15 = arith.divf %13, %14 : vector<8x1xf32>
    %16 = arith.mulf %10, %10 : vector<8x1xf32>
    %17 = arith.subf %15, %16 : vector<8x1xf32>
    %18 = vector.broadcast %10 : vector<8x1xf32> to vector<8x32xf32>
    %19 = arith.subf %1, %18 : vector<8x32xf32>
    %cst_11 = arith.constant 9.99999974E-6 : f32
    %20 = vector.broadcast %cst_11 : f32 to vector<8x1xf32>
    %21 = arith.addf %17, %20 : vector<8x1xf32>
    %22 = math.rsqrt %21 : vector<8x1xf32>
    %23 = vector.broadcast %22 : vector<8x1xf32> to vector<8x32xf32>
    %24 = arith.mulf %19, %23 : vector<8x32xf32>
    %25 = vector.shape_cast %4 : vector<32xf32> to vector<1x32xf32>
    %26 = vector.broadcast %25 : vector<1x32xf32> to vector<8x32xf32>
    %27 = arith.mulf %24, %26 : vector<8x32xf32>
    %28 = vector.shape_cast %6 : vector<32xf32> to vector<1x32xf32>
    %29 = vector.broadcast %28 : vector<1x32xf32> to vector<8x32xf32>
    %30 = arith.addf %27, %29 : vector<8x32xf32>
    %31 = arith.addf %30, %2 : vector<8x32xf32>
    %c0_12 = arith.constant 0 : index
    %c0_13 = arith.constant 0 : index
    %c0_14 = arith.constant 0 : index
    %32 = vector.load %arg5[%c0_12, %c0_13, %c0_14] : memref<2x32x32xbf16, #tpu.memory_space<vmem>>, vector<1x32x32xbf16>
    %33 = vector.shape_cast %32 : vector<1x32x32xbf16> to vector<32x32xbf16>
    %c0_15 = arith.constant 0 : index
    %c0_16 = arith.constant 0 : index
    %34 = vector.load %arg6[%c0_15, %c0_16] : memref<2x32xf32, #tpu.memory_space<vmem>>, vector<1x32xf32>
    %35 = vector.shape_cast %34 : vector<1x32xf32> to vector<32xf32>
    %36 = arith.truncf %31 : vector<8x32xf32> to vector<8x32xbf16>
    %cst_17 = arith.constant dense<0.000000e+00> : vector<8x32xf32>
    %37 = tpu.matmul %36, %33, %cst_17 {dimension_numbers = #tpu.dot_dimension_numbers<[1], [0], [0], [1], [0, 0, 1, 1], [], []>} : vector<8x32xbf16>, vector<32x32xbf16>, vector<8x32xf32> -> vector<8x32xf32>
    %38 = vector.shape_cast %35 : vector<32xf32> to vector<1x32xf32>
    %39 = vector.broadcast %38 : vector<1x32xf32> to vector<8x32xf32>
    %40 = arith.addf %37, %39 : vector<8x32xf32>
    %c0_18 = arith.constant 0 : index
    %c0_19 = arith.constant 0 : index
    %c0_20 = arith.constant 0 : index
    %41 = vector.load %arg7[%c0_18, %c0_19, %c0_20] : memref<2x32x32xbf16, #tpu.memory_space<vmem>>, vector<1x32x32xbf16>
    %42 = vector.shape_cast %41 : vector<1x32x32xbf16> to vector<32x32xbf16>
    %c0_21 = arith.constant 0 : index
    %c0_22 = arith.constant 0 : index
    %43 = vector.load %arg8[%c0_21, %c0_22] : memref<2x32xf32, #tpu.memory_space<vmem>>, vector<1x32xf32>
    %44 = vector.shape_cast %43 : vector<1x32xf32> to vector<32xf32>
    %45 = arith.truncf %31 : vector<8x32xf32> to vector<8x32xbf16>
    %cst_23 = arith.constant dense<0.000000e+00> : vector<8x32xf32>
    %46 = tpu.matmul %45, %42, %cst_23 {dimension_numbers = #tpu.dot_dimension_numbers<[1], [0], [0], [1], [0, 0, 1, 1], [], []>} : vector<8x32xbf16>, vector<32x32xbf16>, vector<8x32xf32> -> vector<8x32xf32>
    %47 = vector.shape_cast %44 : vector<32xf32> to vector<1x32xf32>
    %48 = vector.broadcast %47 : vector<1x32xf32> to vector<8x32xf32>
    %49 = arith.addf %46, %48 : vector<8x32xf32>
    %c0_24 = arith.constant 0 : index
    %c0_25 = arith.constant 0 : index
    %c0_26 = arith.constant 0 : index
    %50 = vector.load %arg9[%c0_24, %c0_25, %c0_26] : memref<2x32x32xbf16, #tpu.memory_space<vmem>>, vector<1x32x32xbf16>
    %51 = vector.shape_cast %50 : vector<1x32x32xbf16> to vector<32x32xbf16>
    %c0_27 = arith.constant 0 : index
    %c0_28 = arith.constant 0 : index
    %52 = vector.load %arg10[%c0_27, %c0_28] : memref<2x32xf32, #tpu.memory_space<vmem>>, vector<1x32xf32>
    %53 = vector.shape_cast %52 : vector<1x32xf32> to vector<32xf32>
    %54 = arith.truncf %30 : vector<8x32xf32> to vector<8x32xbf16>
    %cst_29 = arith.constant dense<0.000000e+00> : vector<8x32xf32>
    %55 = tpu.matmul %54, %51, %cst_29 {dimension_numbers = #tpu.dot_dimension_numbers<[1], [0], [0], [1], [0, 0, 1, 1], [], []>} : vector<8x32xbf16>, vector<32x32xbf16>, vector<8x32xf32> -> vector<8x32xf32>
    %56 = vector.shape_cast %53 : vector<32xf32> to vector<1x32xf32>
    %57 = vector.broadcast %56 : vector<1x32xf32> to vector<8x32xf32>
    %58 = arith.addf %55, %57 : vector<8x32xf32>
    %59 = arith.truncf %40 : vector<8x32xf32> to vector<8x32xbf16>
    %60 = arith.truncf %49 : vector<8x32xf32> to vector<8x32xbf16>
    %61 = arith.truncf %58 : vector<8x32xf32> to vector<8x32xbf16>
    %62 = vector.extract_strided_slice %59 {offsets = [0, 0], sizes = [8, 8], strides = [1, 1]} : vector<8x32xbf16> to vector<8x8xbf16>
    %63 = vector.extract_strided_slice %60 {offsets = [0, 0], sizes = [8, 8], strides = [1, 1]} : vector<8x32xbf16> to vector<8x8xbf16>
    %64 = vector.extract_strided_slice %61 {offsets = [0, 0], sizes = [8, 8], strides = [1, 1]} : vector<8x32xbf16> to vector<8x8xbf16>
    %cst_30 = arith.constant dense<0.000000e+00> : vector<8x8xf32>
    %65 = tpu.matmul %62, %63, %cst_30 {dimension_numbers = #tpu.dot_dimension_numbers<[1], [1], [0], [0], [0, 0, 1, 0], [], []>} : vector<8x8xbf16>, vector<8x8xbf16>, vector<8x8xf32> -> vector<8x8xf32>
    %cst_31 = arith.constant dense<0xFF800000> : vector<8xf32>
    %66 = vector.multi_reduction <maximumf>, %65, %cst_31 [1] : vector<8x8xf32> to vector<8xf32>
    %67 = vector.shape_cast %66 : vector<8xf32> to vector<8x1xf32>
    %68 = vector.broadcast %67 : vector<8x1xf32> to vector<8x8xf32>
    %69 = arith.subf %65, %68 : vector<8x8xf32>
    %70 = math.exp %69 : vector<8x8xf32>
    %cst_32 = arith.constant dense<0.000000e+00> : vector<8xf32>
    %71 = vector.multi_reduction <add>, %70, %cst_32 [1] : vector<8x8xf32> to vector<8xf32>
    %72 = vector.shape_cast %71 : vector<8xf32> to vector<8x1xf32>
    %73 = tpu.reciprocal %72 {approx = true} : vector<8x1xf32> -> vector<8x1xf32>
    %74 = vector.broadcast %73 : vector<8x1xf32> to vector<8x8xf32>
    %75 = arith.mulf %70, %74 : vector<8x8xf32>
    %76 = arith.truncf %75 : vector<8x8xf32> to vector<8x8xbf16>
    %cst_33 = arith.constant dense<0.000000e+00> : vector<8x8xf32>
    %77 = tpu.matmul %76, %64, %cst_33 {dimension_numbers = #tpu.dot_dimension_numbers<[1], [0], [0], [1], [0, 0, 1, 1], [], []>} : vector<8x8xbf16>, vector<8x8xbf16>, vector<8x8xf32> -> vector<8x8xf32>
    %78 = vector.extract_strided_slice %59 {offsets = [0, 8], sizes = [8, 8], strides = [1, 1]} : vector<8x32xbf16> to vector<8x8xbf16>
    %79 = vector.extract_strided_slice %60 {offsets = [0, 8], sizes = [8, 8], strides = [1, 1]} : vector<8x32xbf16> to vector<8x8xbf16>
    %80 = vector.extract_strided_slice %61 {offsets = [0, 8], sizes = [8, 8], strides = [1, 1]} : vector<8x32xbf16> to vector<8x8xbf16>
    %cst_34 = arith.constant dense<0.000000e+00> : vector<8x8xf32>
    %81 = tpu.matmul %78, %79, %cst_34 {dimension_numbers = #tpu.dot_dimension_numbers<[1], [1], [0], [0], [0, 0, 1, 0], [], []>} : vector<8x8xbf16>, vector<8x8xbf16>, vector<8x8xf32> -> vector<8x8xf32>
    %cst_35 = arith.constant dense<0xFF800000> : vector<8xf32>
    %82 = vector.multi_reduction <maximumf>, %81, %cst_35 [1] : vector<8x8xf32> to vector<8xf32>
    %83 = vector.shape_cast %82 : vector<8xf32> to vector<8x1xf32>
    %84 = vector.broadcast %83 : vector<8x1xf32> to vector<8x8xf32>
    %85 = arith.subf %81, %84 : vector<8x8xf32>
    %86 = math.exp %85 : vector<8x8xf32>
    %cst_36 = arith.constant dense<0.000000e+00> : vector<8xf32>
    %87 = vector.multi_reduction <add>, %86, %cst_36 [1] : vector<8x8xf32> to vector<8xf32>
    %88 = vector.shape_cast %87 : vector<8xf32> to vector<8x1xf32>
    %89 = tpu.reciprocal %88 {approx = true} : vector<8x1xf32> -> vector<8x1xf32>
    %90 = vector.broadcast %89 : vector<8x1xf32> to vector<8x8xf32>
    %91 = arith.mulf %86, %90 : vector<8x8xf32>
    %92 = arith.truncf %91 : vector<8x8xf32> to vector<8x8xbf16>
    %cst_37 = arith.constant dense<0.000000e+00> : vector<8x8xf32>
    %93 = tpu.matmul %92, %80, %cst_37 {dimension_numbers = #tpu.dot_dimension_numbers<[1], [0], [0], [1], [0, 0, 1, 1], [], []>} : vector<8x8xbf16>, vector<8x8xbf16>, vector<8x8xf32> -> vector<8x8xf32>
    %94 = vector.extract_strided_slice %59 {offsets = [0, 16], sizes = [8, 8], strides = [1, 1]} : vector<8x32xbf16> to vector<8x8xbf16>
    %95 = vector.extract_strided_slice %60 {offsets = [0, 16], sizes = [8, 8], strides = [1, 1]} : vector<8x32xbf16> to vector<8x8xbf16>
    %96 = vector.extract_strided_slice %61 {offsets = [0, 16], sizes = [8, 8], strides = [1, 1]} : vector<8x32xbf16> to vector<8x8xbf16>
    %cst_38 = arith.constant dense<0.000000e+00> : vector<8x8xf32>
    %97 = tpu.matmul %94, %95, %cst_38 {dimension_numbers = #tpu.dot_dimension_numbers<[1], [1], [0], [0], [0, 0, 1, 0], [], []>} : vector<8x8xbf16>, vector<8x8xbf16>, vector<8x8xf32> -> vector<8x8xf32>
    %cst_39 = arith.constant dense<0xFF800000> : vector<8xf32>
    %98 = vector.multi_reduction <maximumf>, %97, %cst_39 [1] : vector<8x8xf32> to vector<8xf32>
    %99 = vector.shape_cast %98 : vector<8xf32> to vector<8x1xf32>
    %100 = vector.broadcast %99 : vector<8x1xf32> to vector<8x8xf32>
    %101 = arith.subf %97, %100 : vector<8x8xf32>
    %102 = math.exp %101 : vector<8x8xf32>
    %cst_40 = arith.constant dense<0.000000e+00> : vector<8xf32>
    %103 = vector.multi_reduction <add>, %102, %cst_40 [1] : vector<8x8xf32> to vector<8xf32>
    %104 = vector.shape_cast %103 : vector<8xf32> to vector<8x1xf32>
    %105 = tpu.reciprocal %104 {approx = true} : vector<8x1xf32> -> vector<8x1xf32>
    %106 = vector.broadcast %105 : vector<8x1xf32> to vector<8x8xf32>
    %107 = arith.mulf %102, %106 : vector<8x8xf32>
    %108 = arith.truncf %107 : vector<8x8xf32> to vector<8x8xbf16>
    %cst_41 = arith.constant dense<0.000000e+00> : vector<8x8xf32>
    %109 = tpu.matmul %108, %96, %cst_41 {dimension_numbers = #tpu.dot_dimension_numbers<[1], [0], [0], [1], [0, 0, 1, 1], [], []>} : vector<8x8xbf16>, vector<8x8xbf16>, vector<8x8xf32> -> vector<8x8xf32>
    %110 = vector.extract_strided_slice %59 {offsets = [0, 24], sizes = [8, 8], strides = [1, 1]} : vector<8x32xbf16> to vector<8x8xbf16>
    %111 = vector.extract_strided_slice %60 {offsets = [0, 24], sizes = [8, 8], strides = [1, 1]} : vector<8x32xbf16> to vector<8x8xbf16>
    %112 = vector.extract_strided_slice %61 {offsets = [0, 24], sizes = [8, 8], strides = [1, 1]} : vector<8x32xbf16> to vector<8x8xbf16>
    %cst_42 = arith.constant dense<0.000000e+00> : vector<8x8xf32>
    %113 = tpu.matmul %110, %111, %cst_42 {dimension_numbers = #tpu.dot_dimension_numbers<[1], [1], [0], [0], [0, 0, 1, 0], [], []>} : vector<8x8xbf16>, vector<8x8xbf16>, vector<8x8xf32> -> vector<8x8xf32>
    %cst_43 = arith.constant dense<0xFF800000> : vector<8xf32>
    %114 = vector.multi_reduction <maximumf>, %113, %cst_43 [1] : vector<8x8xf32> to vector<8xf32>
    %115 = vector.shape_cast %114 : vector<8xf32> to vector<8x1xf32>
    %116 = vector.broadcast %115 : vector<8x1xf32> to vector<8x8xf32>
    %117 = arith.subf %113, %116 : vector<8x8xf32>
    %118 = math.exp %117 : vector<8x8xf32>
    %cst_44 = arith.constant dense<0.000000e+00> : vector<8xf32>
    %119 = vector.multi_reduction <add>, %118, %cst_44 [1] : vector<8x8xf32> to vector<8xf32>
    %120 = vector.shape_cast %119 : vector<8xf32> to vector<8x1xf32>
    %121 = tpu.reciprocal %120 {approx = true} : vector<8x1xf32> -> vector<8x1xf32>
    %122 = vector.broadcast %121 : vector<8x1xf32> to vector<8x8xf32>
    %123 = arith.mulf %118, %122 : vector<8x8xf32>
    %124 = arith.truncf %123 : vector<8x8xf32> to vector<8x8xbf16>
    %cst_45 = arith.constant dense<0.000000e+00> : vector<8x8xf32>
    %125 = tpu.matmul %124, %112, %cst_45 {dimension_numbers = #tpu.dot_dimension_numbers<[1], [0], [0], [1], [0, 0, 1, 1], [], []>} : vector<8x8xbf16>, vector<8x8xbf16>, vector<8x8xf32> -> vector<8x8xf32>
    %126 = tpu.concatenate %77, %93, %109, %125 in 1 : vector<8x8xf32>, vector<8x8xf32>, vector<8x8xf32>, vector<8x8xf32> -> vector<8x32xf32>
    %c0_46 = arith.constant 0 : index
    %c0_47 = arith.constant 0 : index
    %c0_48 = arith.constant 0 : index
    %127 = vector.load %arg11[%c0_46, %c0_47, %c0_48] : memref<2x32x32xbf16, #tpu.memory_space<vmem>>, vector<1x32x32xbf16>
    %128 = vector.shape_cast %127 : vector<1x32x32xbf16> to vector<32x32xbf16>
    %c0_49 = arith.constant 0 : index
    %c0_50 = arith.constant 0 : index
    %129 = vector.load %arg12[%c0_49, %c0_50] : memref<2x32xf32, #tpu.memory_space<vmem>>, vector<1x32xf32>
    %130 = vector.shape_cast %129 : vector<1x32xf32> to vector<32xf32>
    %131 = arith.truncf %126 : vector<8x32xf32> to vector<8x32xbf16>
    %cst_51 = arith.constant dense<0.000000e+00> : vector<8x32xf32>
    %132 = tpu.matmul %131, %128, %cst_51 {dimension_numbers = #tpu.dot_dimension_numbers<[1], [0], [0], [1], [0, 0, 1, 1], [], []>} : vector<8x32xbf16>, vector<32x32xbf16>, vector<8x32xf32> -> vector<8x32xf32>
    %133 = vector.shape_cast %130 : vector<32xf32> to vector<1x32xf32>
    %134 = vector.broadcast %133 : vector<1x32xf32> to vector<8x32xf32>
    %135 = arith.addf %132, %134 : vector<8x32xf32>
    %136 = arith.addf %1, %135 : vector<8x32xf32>
    %c0_52 = arith.constant 0 : index
    %c0_53 = arith.constant 0 : index
    %137 = vector.load %arg13[%c0_52, %c0_53] : memref<2x32xf32, #tpu.memory_space<vmem>>, vector<1x32xf32>
    %138 = vector.shape_cast %137 : vector<1x32xf32> to vector<32xf32>
    %c0_54 = arith.constant 0 : index
    %c0_55 = arith.constant 0 : index
    %139 = vector.load %arg14[%c0_54, %c0_55] : memref<2x32xf32, #tpu.memory_space<vmem>>, vector<1x32xf32>
    %140 = vector.shape_cast %139 : vector<1x32xf32> to vector<32xf32>
    %cst_56 = arith.constant dense<0.000000e+00> : vector<8xf32>
    %141 = vector.multi_reduction <add>, %136, %cst_56 [1] : vector<8x32xf32> to vector<8xf32>
    %142 = vector.shape_cast %141 : vector<8xf32> to vector<8x1xf32>
    %cst_57 = arith.constant 3.200000e+01 : f32
    %143 = vector.broadcast %cst_57 : f32 to vector<8x1xf32>
    %144 = arith.divf %142, %143 : vector<8x1xf32>
    %145 = arith.mulf %136, %136 : vector<8x32xf32>
    %cst_58 = arith.constant dense<0.000000e+00> : vector<8xf32>
    %146 = vector.multi_reduction <add>, %145, %cst_58 [1] : vector<8x32xf32> to vector<8xf32>
    %147 = vector.shape_cast %146 : vector<8xf32> to vector<8x1xf32>
    %cst_59 = arith.constant 3.200000e+01 : f32
    %148 = vector.broadcast %cst_59 : f32 to vector<8x1xf32>
    %149 = arith.divf %147, %148 : vector<8x1xf32>
    %150 = arith.mulf %144, %144 : vector<8x1xf32>
    %151 = arith.subf %149, %150 : vector<8x1xf32>
    %152 = vector.broadcast %144 : vector<8x1xf32> to vector<8x32xf32>
    %153 = arith.subf %136, %152 : vector<8x32xf32>
    %cst_60 = arith.constant 9.99999974E-6 : f32
    %154 = vector.broadcast %cst_60 : f32 to vector<8x1xf32>
    %155 = arith.addf %151, %154 : vector<8x1xf32>
    %156 = math.rsqrt %155 : vector<8x1xf32>
    %157 = vector.broadcast %156 : vector<8x1xf32> to vector<8x32xf32>
    %158 = arith.mulf %153, %157 : vector<8x32xf32>
    %159 = vector.shape_cast %138 : vector<32xf32> to vector<1x32xf32>
    %160 = vector.broadcast %159 : vector<1x32xf32> to vector<8x32xf32>
    %161 = arith.mulf %158, %160 : vector<8x32xf32>
    %162 = vector.shape_cast %140 : vector<32xf32> to vector<1x32xf32>
    %163 = vector.broadcast %162 : vector<1x32xf32> to vector<8x32xf32>
    %164 = arith.addf %161, %163 : vector<8x32xf32>
    %c0_61 = arith.constant 0 : index
    %c0_62 = arith.constant 0 : index
    %c0_63 = arith.constant 0 : index
    %165 = vector.load %arg15[%c0_61, %c0_62, %c0_63] : memref<2x32x64xbf16, #tpu.memory_space<vmem>>, vector<1x32x64xbf16>
    %166 = vector.shape_cast %165 : vector<1x32x64xbf16> to vector<32x64xbf16>
    %c0_64 = arith.constant 0 : index
    %c0_65 = arith.constant 0 : index
    %167 = vector.load %arg16[%c0_64, %c0_65] : memref<2x64xf32, #tpu.memory_space<vmem>>, vector<1x64xf32>
    %168 = vector.shape_cast %167 : vector<1x64xf32> to vector<64xf32>
    %169 = arith.truncf %164 : vector<8x32xf32> to vector<8x32xbf16>
    %cst_66 = arith.constant dense<0.000000e+00> : vector<8x64xf32>
    %170 = tpu.matmul %169, %166, %cst_66 {dimension_numbers = #tpu.dot_dimension_numbers<[1], [0], [0], [1], [0, 0, 1, 1], [], []>} : vector<8x32xbf16>, vector<32x64xbf16>, vector<8x64xf32> -> vector<8x64xf32>
    %171 = vector.shape_cast %168 : vector<64xf32> to vector<1x64xf32>
    %172 = vector.broadcast %171 : vector<1x64xf32> to vector<8x64xf32>
    %173 = arith.addf %170, %172 : vector<8x64xf32>
    %cst_67 = arith.constant 0.000000e+00 : f32
    %174 = vector.broadcast %cst_67 : f32 to vector<8x64xf32>
    %175 = arith.maximumf %173, %174 : vector<8x64xf32>
    %c0_68 = arith.constant 0 : index
    %c0_69 = arith.constant 0 : index
    %c0_70 = arith.constant 0 : index
    %176 = vector.load %arg17[%c0_68, %c0_69, %c0_70] : memref<2x64x32xbf16, #tpu.memory_space<vmem>>, vector<1x64x32xbf16>
    %177 = vector.shape_cast %176 : vector<1x64x32xbf16> to vector<64x32xbf16>
    %c0_71 = arith.constant 0 : index
    %c0_72 = arith.constant 0 : index
    %178 = vector.load %arg18[%c0_71, %c0_72] : memref<2x32xf32, #tpu.memory_space<vmem>>, vector<1x32xf32>
    %179 = vector.shape_cast %178 : vector<1x32xf32> to vector<32xf32>
    %180 = arith.truncf %175 : vector<8x64xf32> to vector<8x64xbf16>
    %cst_73 = arith.constant dense<0.000000e+00> : vector<8x32xf32>
    %181 = tpu.matmul %180, %177, %cst_73 {dimension_numbers = #tpu.dot_dimension_numbers<[1], [0], [0], [1], [0, 0, 1, 1], [], []>} : vector<8x64xbf16>, vector<64x32xbf16>, vector<8x32xf32> -> vector<8x32xf32>
    %182 = vector.shape_cast %179 : vector<32xf32> to vector<1x32xf32>
    %183 = vector.broadcast %182 : vector<1x32xf32> to vector<8x32xf32>
    %184 = arith.addf %181, %183 : vector<8x32xf32>
    %185 = arith.addf %136, %184 : vector<8x32xf32>
    %c1 = arith.constant 1 : index
    %c0_74 = arith.constant 0 : index
    %186 = vector.load %arg3[%c1, %c0_74] : memref<2x32xf32, #tpu.memory_space<vmem>>, vector<1x32xf32>
    %187 = vector.shape_cast %186 : vector<1x32xf32> to vector<32xf32>
    %c1_75 = arith.constant 1 : index
    %c0_76 = arith.constant 0 : index
    %188 = vector.load %arg4[%c1_75, %c0_76] : memref<2x32xf32, #tpu.memory_space<vmem>>, vector<1x32xf32>
    %189 = vector.shape_cast %188 : vector<1x32xf32> to vector<32xf32>
    %cst_77 = arith.constant dense<0.000000e+00> : vector<8xf32>
    %190 = vector.multi_reduction <add>, %185, %cst_77 [1] : vector<8x32xf32> to vector<8xf32>
    %191 = vector.shape_cast %190 : vector<8xf32> to vector<8x1xf32>
    %cst_78 = arith.constant 3.200000e+01 : f32
    %192 = vector.broadcast %cst_78 : f32 to vector<8x1xf32>
    %193 = arith.divf %191, %192 : vector<8x1xf32>
    %194 = arith.mulf %185, %185 : vector<8x32xf32>
    %cst_79 = arith.constant dense<0.000000e+00> : vector<8xf32>
    %195 = vector.multi_reduction <add>, %194, %cst_79 [1] : vector<8x32xf32> to vector<8xf32>
    %196 = vector.shape_cast %195 : vector<8xf32> to vector<8x1xf32>
    %cst_80 = arith.constant 3.200000e+01 : f32
    %197 = vector.broadcast %cst_80 : f32 to vector<8x1xf32>
    %198 = arith.divf %196, %197 : vector<8x1xf32>
    %199 = arith.mulf %193, %193 : vector<8x1xf32>
    %200 = arith.subf %198, %199 : vector<8x1xf32>
    %201 = vector.broadcast %193 : vector<8x1xf32> to vector<8x32xf32>
    %202 = arith.subf %185, %201 : vector<8x32xf32>
    %cst_81 = arith.constant 9.99999974E-6 : f32
    %203 = vector.broadcast %cst_81 : f32 to vector<8x1xf32>
    %204 = arith.addf %200, %203 : vector<8x1xf32>
    %205 = math.rsqrt %204 : vector<8x1xf32>
    %206 = vector.broadcast %205 : vector<8x1xf32> to vector<8x32xf32>
    %207 = arith.mulf %202, %206 : vector<8x32xf32>
    %208 = vector.shape_cast %187 : vector<32xf32> to vector<1x32xf32>
    %209 = vector.broadcast %208 : vector<1x32xf32> to vector<8x32xf32>
    %210 = arith.mulf %207, %209 : vector<8x32xf32>
    %211 = vector.shape_cast %189 : vector<32xf32> to vector<1x32xf32>
    %212 = vector.broadcast %211 : vector<1x32xf32> to vector<8x32xf32>
    %213 = arith.addf %210, %212 : vector<8x32xf32>
    %214 = arith.addf %213, %2 : vector<8x32xf32>
    %c1_82 = arith.constant 1 : index
    %c0_83 = arith.constant 0 : index
    %c0_84 = arith.constant 0 : index
    %215 = vector.load %arg5[%c1_82, %c0_83, %c0_84] : memref<2x32x32xbf16, #tpu.memory_space<vmem>>, vector<1x32x32xbf16>
    %216 = vector.shape_cast %215 : vector<1x32x32xbf16> to vector<32x32xbf16>
    %c1_85 = arith.constant 1 : index
    %c0_86 = arith.constant 0 : index
    %217 = vector.load %arg6[%c1_85, %c0_86] : memref<2x32xf32, #tpu.memory_space<vmem>>, vector<1x32xf32>
    %218 = vector.shape_cast %217 : vector<1x32xf32> to vector<32xf32>
    %219 = arith.truncf %214 : vector<8x32xf32> to vector<8x32xbf16>
    %cst_87 = arith.constant dense<0.000000e+00> : vector<8x32xf32>
    %220 = tpu.matmul %219, %216, %cst_87 {dimension_numbers = #tpu.dot_dimension_numbers<[1], [0], [0], [1], [0, 0, 1, 1], [], []>} : vector<8x32xbf16>, vector<32x32xbf16>, vector<8x32xf32> -> vector<8x32xf32>
    %221 = vector.shape_cast %218 : vector<32xf32> to vector<1x32xf32>
    %222 = vector.broadcast %221 : vector<1x32xf32> to vector<8x32xf32>
    %223 = arith.addf %220, %222 : vector<8x32xf32>
    %c1_88 = arith.constant 1 : index
    %c0_89 = arith.constant 0 : index
    %c0_90 = arith.constant 0 : index
    %224 = vector.load %arg7[%c1_88, %c0_89, %c0_90] : memref<2x32x32xbf16, #tpu.memory_space<vmem>>, vector<1x32x32xbf16>
    %225 = vector.shape_cast %224 : vector<1x32x32xbf16> to vector<32x32xbf16>
    %c1_91 = arith.constant 1 : index
    %c0_92 = arith.constant 0 : index
    %226 = vector.load %arg8[%c1_91, %c0_92] : memref<2x32xf32, #tpu.memory_space<vmem>>, vector<1x32xf32>
    %227 = vector.shape_cast %226 : vector<1x32xf32> to vector<32xf32>
    %228 = arith.truncf %214 : vector<8x32xf32> to vector<8x32xbf16>
    %cst_93 = arith.constant dense<0.000000e+00> : vector<8x32xf32>
    %229 = tpu.matmul %228, %225, %cst_93 {dimension_numbers = #tpu.dot_dimension_numbers<[1], [0], [0], [1], [0, 0, 1, 1], [], []>} : vector<8x32xbf16>, vector<32x32xbf16>, vector<8x32xf32> -> vector<8x32xf32>
    %230 = vector.shape_cast %227 : vector<32xf32> to vector<1x32xf32>
    %231 = vector.broadcast %230 : vector<1x32xf32> to vector<8x32xf32>
    %232 = arith.addf %229, %231 : vector<8x32xf32>
    %c1_94 = arith.constant 1 : index
    %c0_95 = arith.constant 0 : index
    %c0_96 = arith.constant 0 : index
    %233 = vector.load %arg9[%c1_94, %c0_95, %c0_96] : memref<2x32x32xbf16, #tpu.memory_space<vmem>>, vector<1x32x32xbf16>
    %234 = vector.shape_cast %233 : vector<1x32x32xbf16> to vector<32x32xbf16>
    %c1_97 = arith.constant 1 : index
    %c0_98 = arith.constant 0 : index
    %235 = vector.load %arg10[%c1_97, %c0_98] : memref<2x32xf32, #tpu.memory_space<vmem>>, vector<1x32xf32>
    %236 = vector.shape_cast %235 : vector<1x32xf32> to vector<32xf32>
    %237 = arith.truncf %213 : vector<8x32xf32> to vector<8x32xbf16>
    %cst_99 = arith.constant dense<0.000000e+00> : vector<8x32xf32>
    %238 = tpu.matmul %237, %234, %cst_99 {dimension_numbers = #tpu.dot_dimension_numbers<[1], [0], [0], [1], [0, 0, 1, 1], [], []>} : vector<8x32xbf16>, vector<32x32xbf16>, vector<8x32xf32> -> vector<8x32xf32>
    %239 = vector.shape_cast %236 : vector<32xf32> to vector<1x32xf32>
    %240 = vector.broadcast %239 : vector<1x32xf32> to vector<8x32xf32>
    %241 = arith.addf %238, %240 : vector<8x32xf32>
    %242 = arith.truncf %223 : vector<8x32xf32> to vector<8x32xbf16>
    %243 = arith.truncf %232 : vector<8x32xf32> to vector<8x32xbf16>
    %244 = arith.truncf %241 : vector<8x32xf32> to vector<8x32xbf16>
    %245 = vector.extract_strided_slice %242 {offsets = [0, 0], sizes = [8, 8], strides = [1, 1]} : vector<8x32xbf16> to vector<8x8xbf16>
    %246 = vector.extract_strided_slice %243 {offsets = [0, 0], sizes = [8, 8], strides = [1, 1]} : vector<8x32xbf16> to vector<8x8xbf16>
    %247 = vector.extract_strided_slice %244 {offsets = [0, 0], sizes = [8, 8], strides = [1, 1]} : vector<8x32xbf16> to vector<8x8xbf16>
    %cst_100 = arith.constant dense<0.000000e+00> : vector<8x8xf32>
    %248 = tpu.matmul %245, %246, %cst_100 {dimension_numbers = #tpu.dot_dimension_numbers<[1], [1], [0], [0], [0, 0, 1, 0], [], []>} : vector<8x8xbf16>, vector<8x8xbf16>, vector<8x8xf32> -> vector<8x8xf32>
    %cst_101 = arith.constant dense<0xFF800000> : vector<8xf32>
    %249 = vector.multi_reduction <maximumf>, %248, %cst_101 [1] : vector<8x8xf32> to vector<8xf32>
    %250 = vector.shape_cast %249 : vector<8xf32> to vector<8x1xf32>
    %251 = vector.broadcast %250 : vector<8x1xf32> to vector<8x8xf32>
    %252 = arith.subf %248, %251 : vector<8x8xf32>
    %253 = math.exp %252 : vector<8x8xf32>
    %cst_102 = arith.constant dense<0.000000e+00> : vector<8xf32>
    %254 = vector.multi_reduction <add>, %253, %cst_102 [1] : vector<8x8xf32> to vector<8xf32>
    %255 = vector.shape_cast %254 : vector<8xf32> to vector<8x1xf32>
    %256 = tpu.reciprocal %255 {approx = true} : vector<8x1xf32> -> vector<8x1xf32>
    %257 = vector.broadcast %256 : vector<8x1xf32> to vector<8x8xf32>
    %258 = arith.mulf %253, %257 : vector<8x8xf32>
    %259 = arith.truncf %258 : vector<8x8xf32> to vector<8x8xbf16>
    %cst_103 = arith.constant dense<0.000000e+00> : vector<8x8xf32>
    %260 = tpu.matmul %259, %247, %cst_103 {dimension_numbers = #tpu.dot_dimension_numbers<[1], [0], [0], [1], [0, 0, 1, 1], [], []>} : vector<8x8xbf16>, vector<8x8xbf16>, vector<8x8xf32> -> vector<8x8xf32>
    %261 = vector.extract_strided_slice %242 {offsets = [0, 8], sizes = [8, 8], strides = [1, 1]} : vector<8x32xbf16> to vector<8x8xbf16>
    %262 = vector.extract_strided_slice %243 {offsets = [0, 8], sizes = [8, 8], strides = [1, 1]} : vector<8x32xbf16> to vector<8x8xbf16>
    %263 = vector.extract_strided_slice %244 {offsets = [0, 8], sizes = [8, 8], strides = [1, 1]} : vector<8x32xbf16> to vector<8x8xbf16>
    %cst_104 = arith.constant dense<0.000000e+00> : vector<8x8xf32>
    %264 = tpu.matmul %261, %262, %cst_104 {dimension_numbers = #tpu.dot_dimension_numbers<[1], [1], [0], [0], [0, 0, 1, 0], [], []>} : vector<8x8xbf16>, vector<8x8xbf16>, vector<8x8xf32> -> vector<8x8xf32>
    %cst_105 = arith.constant dense<0xFF800000> : vector<8xf32>
    %265 = vector.multi_reduction <maximumf>, %264, %cst_105 [1] : vector<8x8xf32> to vector<8xf32>
    %266 = vector.shape_cast %265 : vector<8xf32> to vector<8x1xf32>
    %267 = vector.broadcast %266 : vector<8x1xf32> to vector<8x8xf32>
    %268 = arith.subf %264, %267 : vector<8x8xf32>
    %269 = math.exp %268 : vector<8x8xf32>
    %cst_106 = arith.constant dense<0.000000e+00> : vector<8xf32>
    %270 = vector.multi_reduction <add>, %269, %cst_106 [1] : vector<8x8xf32> to vector<8xf32>
    %271 = vector.shape_cast %270 : vector<8xf32> to vector<8x1xf32>
    %272 = tpu.reciprocal %271 {approx = true} : vector<8x1xf32> -> vector<8x1xf32>
    %273 = vector.broadcast %272 : vector<8x1xf32> to vector<8x8xf32>
    %274 = arith.mulf %269, %273 : vector<8x8xf32>
    %275 = arith.truncf %274 : vector<8x8xf32> to vector<8x8xbf16>
    %cst_107 = arith.constant dense<0.000000e+00> : vector<8x8xf32>
    %276 = tpu.matmul %275, %263, %cst_107 {dimension_numbers = #tpu.dot_dimension_numbers<[1], [0], [0], [1], [0, 0, 1, 1], [], []>} : vector<8x8xbf16>, vector<8x8xbf16>, vector<8x8xf32> -> vector<8x8xf32>
    %277 = vector.extract_strided_slice %242 {offsets = [0, 16], sizes = [8, 8], strides = [1, 1]} : vector<8x32xbf16> to vector<8x8xbf16>
    %278 = vector.extract_strided_slice %243 {offsets = [0, 16], sizes = [8, 8], strides = [1, 1]} : vector<8x32xbf16> to vector<8x8xbf16>
    %279 = vector.extract_strided_slice %244 {offsets = [0, 16], sizes = [8, 8], strides = [1, 1]} : vector<8x32xbf16> to vector<8x8xbf16>
    %cst_108 = arith.constant dense<0.000000e+00> : vector<8x8xf32>
    %280 = tpu.matmul %277, %278, %cst_108 {dimension_numbers = #tpu.dot_dimension_numbers<[1], [1], [0], [0], [0, 0, 1, 0], [], []>} : vector<8x8xbf16>, vector<8x8xbf16>, vector<8x8xf32> -> vector<8x8xf32>
    %cst_109 = arith.constant dense<0xFF800000> : vector<8xf32>
    %281 = vector.multi_reduction <maximumf>, %280, %cst_109 [1] : vector<8x8xf32> to vector<8xf32>
    %282 = vector.shape_cast %281 : vector<8xf32> to vector<8x1xf32>
    %283 = vector.broadcast %282 : vector<8x1xf32> to vector<8x8xf32>
    %284 = arith.subf %280, %283 : vector<8x8xf32>
    %285 = math.exp %284 : vector<8x8xf32>
    %cst_110 = arith.constant dense<0.000000e+00> : vector<8xf32>
    %286 = vector.multi_reduction <add>, %285, %cst_110 [1] : vector<8x8xf32> to vector<8xf32>
    %287 = vector.shape_cast %286 : vector<8xf32> to vector<8x1xf32>
    %288 = tpu.reciprocal %287 {approx = true} : vector<8x1xf32> -> vector<8x1xf32>
    %289 = vector.broadcast %288 : vector<8x1xf32> to vector<8x8xf32>
    %290 = arith.mulf %285, %289 : vector<8x8xf32>
    %291 = arith.truncf %290 : vector<8x8xf32> to vector<8x8xbf16>
    %cst_111 = arith.constant dense<0.000000e+00> : vector<8x8xf32>
    %292 = tpu.matmul %291, %279, %cst_111 {dimension_numbers = #tpu.dot_dimension_numbers<[1], [0], [0], [1], [0, 0, 1, 1], [], []>} : vector<8x8xbf16>, vector<8x8xbf16>, vector<8x8xf32> -> vector<8x8xf32>
    %293 = vector.extract_strided_slice %242 {offsets = [0, 24], sizes = [8, 8], strides = [1, 1]} : vector<8x32xbf16> to vector<8x8xbf16>
    %294 = vector.extract_strided_slice %243 {offsets = [0, 24], sizes = [8, 8], strides = [1, 1]} : vector<8x32xbf16> to vector<8x8xbf16>
    %295 = vector.extract_strided_slice %244 {offsets = [0, 24], sizes = [8, 8], strides = [1, 1]} : vector<8x32xbf16> to vector<8x8xbf16>
    %cst_112 = arith.constant dense<0.000000e+00> : vector<8x8xf32>
    %296 = tpu.matmul %293, %294, %cst_112 {dimension_numbers = #tpu.dot_dimension_numbers<[1], [1], [0], [0], [0, 0, 1, 0], [], []>} : vector<8x8xbf16>, vector<8x8xbf16>, vector<8x8xf32> -> vector<8x8xf32>
    %cst_113 = arith.constant dense<0xFF800000> : vector<8xf32>
    %297 = vector.multi_reduction <maximumf>, %296, %cst_113 [1] : vector<8x8xf32> to vector<8xf32>
    %298 = vector.shape_cast %297 : vector<8xf32> to vector<8x1xf32>
    %299 = vector.broadcast %298 : vector<8x1xf32> to vector<8x8xf32>
    %300 = arith.subf %296, %299 : vector<8x8xf32>
    %301 = math.exp %300 : vector<8x8xf32>
    %cst_114 = arith.constant dense<0.000000e+00> : vector<8xf32>
    %302 = vector.multi_reduction <add>, %301, %cst_114 [1] : vector<8x8xf32> to vector<8xf32>
    %303 = vector.shape_cast %302 : vector<8xf32> to vector<8x1xf32>
    %304 = tpu.reciprocal %303 {approx = true} : vector<8x1xf32> -> vector<8x1xf32>
    %305 = vector.broadcast %304 : vector<8x1xf32> to vector<8x8xf32>
    %306 = arith.mulf %301, %305 : vector<8x8xf32>
    %307 = arith.truncf %306 : vector<8x8xf32> to vector<8x8xbf16>
    %cst_115 = arith.constant dense<0.000000e+00> : vector<8x8xf32>
    %308 = tpu.matmul %307, %295, %cst_115 {dimension_numbers = #tpu.dot_dimension_numbers<[1], [0], [0], [1], [0, 0, 1, 1], [], []>} : vector<8x8xbf16>, vector<8x8xbf16>, vector<8x8xf32> -> vector<8x8xf32>
    %309 = tpu.concatenate %260, %276, %292, %308 in 1 : vector<8x8xf32>, vector<8x8xf32>, vector<8x8xf32>, vector<8x8xf32> -> vector<8x32xf32>
    %c1_116 = arith.constant 1 : index
    %c0_117 = arith.constant 0 : index
    %c0_118 = arith.constant 0 : index
    %310 = vector.load %arg11[%c1_116, %c0_117, %c0_118] : memref<2x32x32xbf16, #tpu.memory_space<vmem>>, vector<1x32x32xbf16>
    %311 = vector.shape_cast %310 : vector<1x32x32xbf16> to vector<32x32xbf16>
    %c1_119 = arith.constant 1 : index
    %c0_120 = arith.constant 0 : index
    %312 = vector.load %arg12[%c1_119, %c0_120] : memref<2x32xf32, #tpu.memory_space<vmem>>, vector<1x32xf32>
    %313 = vector.shape_cast %312 : vector<1x32xf32> to vector<32xf32>
    %314 = arith.truncf %309 : vector<8x32xf32> to vector<8x32xbf16>
    %cst_121 = arith.constant dense<0.000000e+00> : vector<8x32xf32>
    %315 = tpu.matmul %314, %311, %cst_121 {dimension_numbers = #tpu.dot_dimension_numbers<[1], [0], [0], [1], [0, 0, 1, 1], [], []>} : vector<8x32xbf16>, vector<32x32xbf16>, vector<8x32xf32> -> vector<8x32xf32>
    %316 = vector.shape_cast %313 : vector<32xf32> to vector<1x32xf32>
    %317 = vector.broadcast %316 : vector<1x32xf32> to vector<8x32xf32>
    %318 = arith.addf %315, %317 : vector<8x32xf32>
    %319 = arith.addf %185, %318 : vector<8x32xf32>
    %c1_122 = arith.constant 1 : index
    %c0_123 = arith.constant 0 : index
    %320 = vector.load %arg13[%c1_122, %c0_123] : memref<2x32xf32, #tpu.memory_space<vmem>>, vector<1x32xf32>
    %321 = vector.shape_cast %320 : vector<1x32xf32> to vector<32xf32>
    %c1_124 = arith.constant 1 : index
    %c0_125 = arith.constant 0 : index
    %322 = vector.load %arg14[%c1_124, %c0_125] : memref<2x32xf32, #tpu.memory_space<vmem>>, vector<1x32xf32>
    %323 = vector.shape_cast %322 : vector<1x32xf32> to vector<32xf32>
    %cst_126 = arith.constant dense<0.000000e+00> : vector<8xf32>
    %324 = vector.multi_reduction <add>, %319, %cst_126 [1] : vector<8x32xf32> to vector<8xf32>
    %325 = vector.shape_cast %324 : vector<8xf32> to vector<8x1xf32>
    %cst_127 = arith.constant 3.200000e+01 : f32
    %326 = vector.broadcast %cst_127 : f32 to vector<8x1xf32>
    %327 = arith.divf %325, %326 : vector<8x1xf32>
    %328 = arith.mulf %319, %319 : vector<8x32xf32>
    %cst_128 = arith.constant dense<0.000000e+00> : vector<8xf32>
    %329 = vector.multi_reduction <add>, %328, %cst_128 [1] : vector<8x32xf32> to vector<8xf32>
    %330 = vector.shape_cast %329 : vector<8xf32> to vector<8x1xf32>
    %cst_129 = arith.constant 3.200000e+01 : f32
    %331 = vector.broadcast %cst_129 : f32 to vector<8x1xf32>
    %332 = arith.divf %330, %331 : vector<8x1xf32>
    %333 = arith.mulf %327, %327 : vector<8x1xf32>
    %334 = arith.subf %332, %333 : vector<8x1xf32>
    %335 = vector.broadcast %327 : vector<8x1xf32> to vector<8x32xf32>
    %336 = arith.subf %319, %335 : vector<8x32xf32>
    %cst_130 = arith.constant 9.99999974E-6 : f32
    %337 = vector.broadcast %cst_130 : f32 to vector<8x1xf32>
    %338 = arith.addf %334, %337 : vector<8x1xf32>
    %339 = math.rsqrt %338 : vector<8x1xf32>
    %340 = vector.broadcast %339 : vector<8x1xf32> to vector<8x32xf32>
    %341 = arith.mulf %336, %340 : vector<8x32xf32>
    %342 = vector.shape_cast %321 : vector<32xf32> to vector<1x32xf32>
    %343 = vector.broadcast %342 : vector<1x32xf32> to vector<8x32xf32>
    %344 = arith.mulf %341, %343 : vector<8x32xf32>
    %345 = vector.shape_cast %323 : vector<32xf32> to vector<1x32xf32>
    %346 = vector.broadcast %345 : vector<1x32xf32> to vector<8x32xf32>
    %347 = arith.addf %344, %346 : vector<8x32xf32>
    %c1_131 = arith.constant 1 : index
    %c0_132 = arith.constant 0 : index
    %c0_133 = arith.constant 0 : index
    %348 = vector.load %arg15[%c1_131, %c0_132, %c0_133] : memref<2x32x64xbf16, #tpu.memory_space<vmem>>, vector<1x32x64xbf16>
    %349 = vector.shape_cast %348 : vector<1x32x64xbf16> to vector<32x64xbf16>
    %c1_134 = arith.constant 1 : index
    %c0_135 = arith.constant 0 : index
    %350 = vector.load %arg16[%c1_134, %c0_135] : memref<2x64xf32, #tpu.memory_space<vmem>>, vector<1x64xf32>
    %351 = vector.shape_cast %350 : vector<1x64xf32> to vector<64xf32>
    %352 = arith.truncf %347 : vector<8x32xf32> to vector<8x32xbf16>
    %cst_136 = arith.constant dense<0.000000e+00> : vector<8x64xf32>
    %353 = tpu.matmul %352, %349, %cst_136 {dimension_numbers = #tpu.dot_dimension_numbers<[1], [0], [0], [1], [0, 0, 1, 1], [], []>} : vector<8x32xbf16>, vector<32x64xbf16>, vector<8x64xf32> -> vector<8x64xf32>
    %354 = vector.shape_cast %351 : vector<64xf32> to vector<1x64xf32>
    %355 = vector.broadcast %354 : vector<1x64xf32> to vector<8x64xf32>
    %356 = arith.addf %353, %355 : vector<8x64xf32>
    %cst_137 = arith.constant 0.000000e+00 : f32
    %357 = vector.broadcast %cst_137 : f32 to vector<8x64xf32>
    %358 = arith.maximumf %356, %357 : vector<8x64xf32>
    %c1_138 = arith.constant 1 : index
    %c0_139 = arith.constant 0 : index
    %c0_140 = arith.constant 0 : index
    %359 = vector.load %arg17[%c1_138, %c0_139, %c0_140] : memref<2x64x32xbf16, #tpu.memory_space<vmem>>, vector<1x64x32xbf16>
    %360 = vector.shape_cast %359 : vector<1x64x32xbf16> to vector<64x32xbf16>
    %c1_141 = arith.constant 1 : index
    %c0_142 = arith.constant 0 : index
    %361 = vector.load %arg18[%c1_141, %c0_142] : memref<2x32xf32, #tpu.memory_space<vmem>>, vector<1x32xf32>
    %362 = vector.shape_cast %361 : vector<1x32xf32> to vector<32xf32>
    %363 = arith.truncf %358 : vector<8x64xf32> to vector<8x64xbf16>
    %cst_143 = arith.constant dense<0.000000e+00> : vector<8x32xf32>
    %364 = tpu.matmul %363, %360, %cst_143 {dimension_numbers = #tpu.dot_dimension_numbers<[1], [0], [0], [1], [0, 0, 1, 1], [], []>} : vector<8x64xbf16>, vector<64x32xbf16>, vector<8x32xf32> -> vector<8x32xf32>
    %365 = vector.shape_cast %362 : vector<32xf32> to vector<1x32xf32>
    %366 = vector.broadcast %365 : vector<1x32xf32> to vector<8x32xf32>
    %367 = arith.addf %364, %366 : vector<8x32xf32>
    %368 = arith.addf %319, %367 : vector<8x32xf32>
    %c0_144 = arith.constant 0 : index
    %c0_145 = arith.constant 0 : index
    %369 = vector.load %arg19[%c0_144, %c0_145] : memref<32x64xbf16, #tpu.memory_space<vmem>>, vector<32x64xbf16>
    %c0_146 = arith.constant 0 : index
    %c0_147 = arith.constant 0 : index
    %370 = vector.load %arg20[%c0_146, %c0_147] : memref<1x64xf32, #tpu.memory_space<vmem>>, vector<1x64xf32>
    %371 = vector.shape_cast %370 : vector<1x64xf32> to vector<64xf32>
    %372 = arith.truncf %368 : vector<8x32xf32> to vector<8x32xbf16>
    %cst_148 = arith.constant dense<0.000000e+00> : vector<8x64xf32>
    %373 = tpu.matmul %372, %369, %cst_148 {dimension_numbers = #tpu.dot_dimension_numbers<[1], [0], [0], [1], [0, 0, 1, 1], [], []>} : vector<8x32xbf16>, vector<32x64xbf16>, vector<8x64xf32> -> vector<8x64xf32>
    %374 = vector.shape_cast %371 : vector<64xf32> to vector<1x64xf32>
    %375 = vector.broadcast %374 : vector<1x64xf32> to vector<8x64xf32>
    %376 = arith.addf %373, %375 : vector<8x64xf32>
    %cst_149 = arith.constant 0.000000e+00 : f32
    %377 = vector.broadcast %cst_149 : f32 to vector<8x64xf32>
    %378 = arith.maximumf %376, %377 : vector<8x64xf32>
    %c0_150 = arith.constant 0 : index
    %c0_151 = arith.constant 0 : index
    %379 = vector.load %arg21[%c0_150, %c0_151] : memref<64x128xbf16, #tpu.memory_space<vmem>>, vector<64x128xbf16>
    %c0_152 = arith.constant 0 : index
    %c0_153 = arith.constant 0 : index
    %380 = vector.load %arg22[%c0_152, %c0_153] : memref<1x128xf32, #tpu.memory_space<vmem>>, vector<1x128xf32>
    %381 = vector.shape_cast %380 : vector<1x128xf32> to vector<128xf32>
    %382 = arith.truncf %378 : vector<8x64xf32> to vector<8x64xbf16>
    %cst_154 = arith.constant dense<0.000000e+00> : vector<8x128xf32>
    %383 = tpu.matmul %382, %379, %cst_154 {dimension_numbers = #tpu.dot_dimension_numbers<[1], [0], [0], [1], [0, 0, 1, 1], [], []>} : vector<8x64xbf16>, vector<64x128xbf16>, vector<8x128xf32> -> vector<8x128xf32>
    %384 = vector.shape_cast %381 : vector<128xf32> to vector<1x128xf32>
    %385 = vector.broadcast %384 : vector<1x128xf32> to vector<8x128xf32>
    %386 = arith.addf %383, %385 : vector<8x128xf32>
    %c0_155 = arith.constant 0 : index
    %c0_156 = arith.constant 0 : index
    %c0_157 = arith.constant 0 : index
    %387 = vector.load %arg23[%c0_155, %c0_156, %c0_157] : memref<1x8x128xf32, #tpu.memory_space<vmem>>, vector<1x8x128xf32>
    %388 = vector.shape_cast %387 : vector<1x8x128xf32> to vector<8x128xf32>
    %389 = vector.shape_cast %386 : vector<8x128xf32> to vector<1x8x128xf32>
    tpu.vector_store %arg23[%c0_155, %c0_156, %c0_157], %389 {strides = array<i32>} : memref<1x8x128xf32, #tpu.memory_space<vmem>>, vector<1x8x128xf32>,
    return
  }
  func.func @transform_0(%arg0: i32) -> (i32, i32, i32) {
    %c0_i32 = arith.constant 0 : i32
    %c0_i32_0 = arith.constant 0 : i32
    %c0_i32_1 = arith.constant 0 : i32
    return %arg0, %c0_i32, %c0_i32_0 : i32, i32, i32
  }
  func.func @transform_1(%arg0: i32) -> (i32, i32) {
    %c0_i32 = arith.constant 0 : i32
    %c0_i32_0 = arith.constant 0 : i32
    %c0_i32_1 = arith.constant 0 : i32
    return %c0_i32, %c0_i32_0 : i32, i32
  }
  func.func @transform_2(%arg0: i32) -> (i32, i32) {
    %c0_i32 = arith.constant 0 : i32
    %c0_i32_0 = arith.constant 0 : i32
    %c0_i32_1 = arith.constant 0 : i32
    return %c0_i32, %c0_i32_0 : i32, i32
  }
  func.func @transform_3(%arg0: i32) -> (i32, i32) {
    %c0_i32 = arith.constant 0 : i32
    %c0_i32_0 = arith.constant 0 : i32
    %c0_i32_1 = arith.constant 0 : i32
    return %c0_i32, %c0_i32_0 : i32, i32
  }
  func.func @transform_4(%arg0: i32) -> (i32, i32, i32) {
    %c0_i32 = arith.constant 0 : i32
    %c0_i32_0 = arith.constant 0 : i32
    %c0_i32_1 = arith.constant 0 : i32
    %c0_i32_2 = arith.constant 0 : i32
    return %c0_i32, %c0_i32_0, %c0_i32_1 : i32, i32, i32
  }
  func.func @transform_5(%arg0: i32) -> (i32, i32) {
    %c0_i32 = arith.constant 0 : i32
    %c0_i32_0 = arith.constant 0 : i32
    %c0_i32_1 = arith.constant 0 : i32
    return %c0_i32, %c0_i32_0 : i32, i32
  }
  func.func @transform_6(%arg0: i32) -> (i32, i32, i32) {
    %c0_i32 = arith.constant 0 : i32
    %c0_i32_0 = arith.constant 0 : i32
    %c0_i32_1 = arith.constant 0 : i32
    %c0_i32_2 = arith.constant 0 : i32
    return %c0_i32, %c0_i32_0, %c0_i32_1 : i32, i32, i32
  }
  func.func @transform_7(%arg0: i32) -> (i32, i32) {
    %c0_i32 = arith.constant 0 : i32
    %c0_i32_0 = arith.constant 0 : i32
    %c0_i32_1 = arith.constant 0 : i32
    return %c0_i32, %c0_i32_0 : i32, i32
  }
  func.func @transform_8(%arg0: i32) -> (i32, i32, i32) {
    %c0_i32 = arith.constant 0 : i32
    %c0_i32_0 = arith.constant 0 : i32
    %c0_i32_1 = arith.constant 0 : i32
    %c0_i32_2 = arith.constant 0 : i32
    return %c0_i32, %c0_i32_0, %c0_i32_1 : i32, i32, i32
  }
  func.func @transform_9(%arg0: i32) -> (i32, i32) {
    %c0_i32 = arith.constant 0 : i32
    %c0_i32_0 = arith.constant 0 : i32
    %c0_i32_1 = arith.constant 0 : i32
    return %c0_i32, %c0_i32_0 : i32, i32
  }
  func.func @transform_10(%arg0: i32) -> (i32, i32, i32) {
    %c0_i32 = arith.constant 0 : i32
    %c0_i32_0 = arith.constant 0 : i32
    %c0_i32_1 = arith.constant 0 : i32
    %c0_i32_2 = arith.constant 0 : i32
    return %c0_i32, %c0_i32_0, %c0_i32_1 : i32, i32, i32
  }
  func.func @transform_11(%arg0: i32) -> (i32, i32) {
    %c0_i32 = arith.constant 0 : i32
    %c0_i32_0 = arith.constant 0 : i32
    %c0_i32_1 = arith.constant 0 : i32
    return %c0_i32, %c0_i32_0 : i32, i32
  }
  func.func @transform_12(%arg0: i32) -> (i32, i32) {
    %c0_i32 = arith.constant 0 : i32
    %c0_i32_0 = arith.constant 0 : i32
    %c0_i32_1 = arith.constant 0 : i32
    return %c0_i32, %c0_i32_0 : i32, i32
  }
  func.func @transform_13(%arg0: i32) -> (i32, i32) {
    %c0_i32 = arith.constant 0 : i32
    %c0_i32_0 = arith.constant 0 : i32
    %c0_i32_1 = arith.constant 0 : i32
    return %c0_i32, %c0_i32_0 : i32, i32
  }
  func.func @transform_14(%arg0: i32) -> (i32, i32, i32) {
    %c0_i32 = arith.constant 0 : i32
    %c0_i32_0 = arith.constant 0 : i32
    %c0_i32_1 = arith.constant 0 : i32
    %c0_i32_2 = arith.constant 0 : i32
    return %c0_i32, %c0_i32_0, %c0_i32_1 : i32, i32, i32
  }
  func.func @transform_15(%arg0: i32) -> (i32, i32) {
    %c0_i32 = arith.constant 0 : i32
    %c0_i32_0 = arith.constant 0 : i32
    %c0_i32_1 = arith.constant 0 : i32
    return %c0_i32, %c0_i32_0 : i32, i32
  }
  func.func @transform_16(%arg0: i32) -> (i32, i32, i32) {
    %c0_i32 = arith.constant 0 : i32
    %c0_i32_0 = arith.constant 0 : i32
    %c0_i32_1 = arith.constant 0 : i32
    %c0_i32_2 = arith.constant 0 : i32
    return %c0_i32, %c0_i32_0, %c0_i32_1 : i32, i32, i32
  }
  func.func @transform_17(%arg0: i32) -> (i32, i32) {
    %c0_i32 = arith.constant 0 : i32
    %c0_i32_0 = arith.constant 0 : i32
    %c0_i32_1 = arith.constant 0 : i32
    return %c0_i32, %c0_i32_0 : i32, i32
  }
  func.func @transform_18(%arg0: i32) -> (i32, i32) {
    %c0_i32 = arith.constant 0 : i32
    %c0_i32_0 = arith.constant 0 : i32
    %c0_i32_1 = arith.constant 0 : i32
    return %c0_i32, %c0_i32_0 : i32, i32
  }
  func.func @transform_19(%arg0: i32) -> (i32, i32) {
    %c0_i32 = arith.constant 0 : i32
    %c0_i32_0 = arith.constant 0 : i32
    %c0_i32_1 = arith.constant 0 : i32
    return %c0_i32, %c0_i32_0 : i32, i32
  }
  func.func @transform_20(%arg0: i32) -> (i32, i32) {
    %c0_i32 = arith.constant 0 : i32
    %c0_i32_0 = arith.constant 0 : i32
    %c0_i32_1 = arith.constant 0 : i32
    return %c0_i32, %c0_i32_0 : i32, i32
  }
  func.func @transform_21(%arg0: i32) -> (i32, i32) {
    %c0_i32 = arith.constant 0 : i32
    %c0_i32_0 = arith.constant 0 : i32
    %c0_i32_1 = arith.constant 0 : i32
    return %c0_i32, %c0_i32_0 : i32, i32
  }
  func.func @transform_22(%arg0: i32) -> (i32, i32, i32) {
    %c0_i32 = arith.constant 0 : i32
    %c0_i32_0 = arith.constant 0 : i32
    %c0_i32_1 = arith.constant 0 : i32
    return %arg0, %c0_i32, %c0_i32_0 : i32, i32, i32
  }
}

</mosaic_0001>

<bundles_post_ra>
// kernel: transformer_encoder_cls_forward.1
= control target key start
LH: loop header
LB: loop body
LE: loop exit
PB: predicated region body
PF: predicated region fallthrough
CT: control target
= control target key end

     0   :  { %s3537_s0 = inlined_call_operand.hbm [shape: f32[2,8,32], index: 0, kind: input, shape index: {}]   ;;  %s3538_s1 = inlined_call_operand.vmem [shape: f32[8,32], index: 1, kind: input, shape index: {}]   ;;  %s3539_s2 = inlined_call_operand.vmem [shape: f32[2,32], index: 2, kind: input, shape index: {}]   ;;  %s3540_s3 = inlined_call_operand.vmem [shape: f32[2,32], index: 3, kind: input, shape index: {}]   ;;  %s3541_s4 = inlined_call_operand.vmem [shape: bf16[2,32,32], index: 4, kind: input, shape index: {}]   ;;  %s3542_s5 = inlined_call_operand.hbm [shape: f32[2,32], index: 5, kind: input, shape index: {}]   ;;  %s3543_s6 = inlined_call_operand.vmem [shape: bf16[2,32,32], index: 6, kind: input, shape index: {}]   ;;  %s3544_s7 = inlined_call_operand.hbm [shape: f32[2,32], index: 7, kind: input, shape index: {}]   ;;  %s3545_s8 = inlined_call_operand.vmem [shape: bf16[2,32,32], index: 8, kind: input, shape index: {}]   ;;  %s3546_s9 = inlined_call_operand.hbm [shape: f32[2,32], index: 9, kind: input, shape index: {}]   ;;  %s3547_s10 = inlined_call_operand.vmem [shape: bf16[2,32,32], index: 10, kind: input, shape index: {}]   ;;  %s3548_s11 = inlined_call_operand.hbm [shape: f32[2,32], index: 11, kind: input, shape index: {}]   ;;  %s3549_s12 = inlined_call_operand.vmem [shape: f32[2,32], index: 12, kind: input, shape index: {}]   ;;  %s3550_s13 = inlined_call_operand.vmem [shape: f32[2,32], index: 13, kind: input, shape index: {}]   ;;  %s3551_s14 = inlined_call_operand.vmem [shape: bf16[2,32,64], index: 14, kind: input, shape index: {}]   ;;  %s3552_s15 = inlined_call_operand.hbm [shape: f32[2,64], index: 15, kind: input, shape index: {}]   ;;  %s3553_s16 = inlined_call_operand.vmem [shape: bf16[2,64,32], index: 16, kind: input, shape index: {}]   ;;  %s3554_s17 = inlined_call_operand.hbm [shape: f32[2,32], index: 17, kind: input, shape index: {}]   ;;  %s3555_s18 = inlined_call_operand.vmem [shape: bf16[32,64], index: 18, kind: input, shape index: {}]   ;;  %s3556_s19 = inlined_call_operand.hbm [shape: f32[1,64], index: 19, kind: input, shape index: {}]   ;;  %s3557_s20 = inlined_call_operand.hbm [shape: bf16[64,128], index: 20, kind: input, shape index: {}]   ;;  %s3558_s21 = inlined_call_operand.hbm [shape: f32[1,128], index: 21, kind: input, shape index: {}]   ;;  %s3559_s22 = inlined_call_operand.vmem [shape: f32[2,8,128], index: 22, kind: output, shape index: {}]  }
   0x1   :  { %3577 = sst [smem:[#allocation24_spill]] %s3537_s0 }
   0x2   :  { %3578 = sst [smem:[#allocation25_spill]] %s3538_s1 }
   0x3   :  { %3579 = sst [smem:[#allocation26_spill]] %s3539_s2 }
   0x4   :  { %3580 = sst [smem:[#allocation27_spill]] %s3540_s3 }
   0x5   :  { %3581 = sst [smem:[#allocation28_spill]] %s3541_s4 }
   0x6   :  { %3582 = sst [smem:[#allocation29_spill]] %s3542_s5 }
   0x7   :  { %3583 = sst [smem:[#allocation30_spill]] %s3543_s6 }
   0x8   :  { %3584 = sst [smem:[#allocation31_spill]] %s3544_s7 }
   0x9   :  { %3585 = sst [smem:[#allocation32_spill]] %s3546_s9 }
   0xa   :  { %3586 = sst [smem:[#allocation33_spill]] %s3549_s12 }
   0xb   :  { %3587 = sst [smem:[#allocation34_spill]] %s3550_s13 }
   0xc   :  { %3588 = sst [smem:[#allocation35_spill]] %s3552_s15 }
   0xd   :  { %3589 = sst [smem:[#allocation36_spill]] %s3555_s18 }
   0xe   :  { %3590 = sst [smem:[#allocation37_spill]] %s3559_s22 }
   0xf   :  { %27 = vsyncpa [#allocation3], 0 }
  0x10   :  { %29 = vsyncpa [#allocation3 + $0x1], 0 }
  0x11   :  { %30 = vsyncpa [#allocation5], 0 }
  0x12   :  { %31 = vsyncpa [#allocation8], 0 }
  0x13   :  { %32 = vsyncpa [#allocation11], 0 }
  0x14   :  { %33 = vsyncpa [#allocation14], 0 }
  0x15   :  { %34 = vsyncpa [#allocation17], 0  ;;  %s3109_s3 = smov 0   ;;  %s3111_s28 = smov 0  }
  0x16   :  { %s3113_s29 = smov 0   ;;  %s3115_s30 = smov 0  }
  0x17 LB: > { %s3591_s23 = sld [smem:[#allocation29_spill]]  ;;  %s3133_s5 = sadd.s32 4294967295, %s2974_s30   ;;  %s2974_s30 = sphi %s3115_s30, %s3618_s30   ;;  %s2970_s29 = sphi %s3113_s29, %s3617_s29   ;;  %s2966_s28 = sphi %s3111_s28, %s3616_s28   ;;  %s2962_s3 = sphi %s3109_s3, %s3615_s3  }
  0x18   : > { %p2162_p0 = scmp.ge.s32.totalorder %s2974_s30, 1  ;;  %p61_p1 = scmp.eq.s32.totalorder %s3133_s5, 0 }
  0x19   : > { %p538_p2 = scmp.lt.s32.totalorder %s2974_s30, 3  ;;  %s2976_s6 = smov [#allocation4]  }
  0x1a   : > { %s564_s25 = sshll.u32 %s2976_s6, 4  ;;  %s3593_s9 = sld [smem:[#allocation32_spill]]  ;;  %s565_s25 = int_to_ptr.vmem [resolvable:$true] %s564_s25 }
  0x1b   : > { %p3138_p3 = pnand %p2162_p0, %p538_p2  ;;  %s2977_s0 = smov [#allocation7]  }
  0x1c   : > { %s3595_s15 = sld [smem:[#allocation35_spill]]  ;;  %s2978_s13 = smov [#allocation10]  }
  0x1d   : > { %s562_s1 = sshll.u32 %s3591_s23, 4  ;;  %p2455_p4 = pneg %p3138_p3  ;;  %s563_s1 = int_to_ptr.hbm [resolvable:$true] %s562_s1 }
  0x1e   : > { %s594_s23 = sshll.u32 %s2977_s0, 4  ;;  %s630_s12 = sshll.u32 %s2978_s13, 4  ;;  %s595_s23 = int_to_ptr.vmem [resolvable:$true] %s594_s23  ;;  %s631_s12 = int_to_ptr.vmem [resolvable:$true] %s630_s12 }
  0x1f   : > { %p3149_p5 = pnand %p2455_p4, %p61_p1  ;;  %s2979_s0 = smov [#allocation13]  }
  0x20   : > { %s592_s27 = sshll.u32 %s3593_s9, 4  ;;  %s658_s9 = sshll.u32 %s3556_s19, 4  ;;  %s593_s27 = int_to_ptr.hbm [resolvable:$true] %s592_s27  ;;  %s659_s9 = int_to_ptr.hbm [resolvable:$true] %s658_s9 }
  0x21   : > { %2458 = dma.hbm_to_vmem [thread:$0]  (!%p3149_p5), %s563_s1, 32, %s565_s25, [#allocation5]  }
  0x22   : > { %s628_s18 = sshll.u32 %s3595_s15, 4  ;;  %s660_s22 = sshll.u32 %s2979_s0, 4  ;;  %s629_s18 = int_to_ptr.hbm [resolvable:$true] %s628_s18  ;;  %s661_s22 = int_to_ptr.vmem [resolvable:$true] %s660_s22 }
  0x23   : > { %2464 = dma.hbm_to_vmem [thread:$0]  (!%p3149_p5), %s593_s27, 32, %s595_s23, [#allocation8]  }
  0x24   : > { %2470 = dma.hbm_to_vmem [thread:$0]  (!%p3149_p5), %s629_s18, 32, %s631_s12, [#allocation11]  }
  0x25   : > { %s3596_s7 = sld [smem:[#allocation31_spill]]  ;;  %s607_s23 = sshll.u32 %s3548_s11, 4  ;;  %s608_s23 = int_to_ptr.hbm [resolvable:$true] %s607_s23 }
  0x26   : > { %2476 = dma.hbm_to_vmem [thread:$0]  (!%p3149_p5), %s659_s9, 16, %s661_s22, [#allocation14]  }
  0x27   : > { %s2980_s13 = smov [#allocation6]   ;;  %s2981_s12 = smov [#allocation9]  }
  0x28   : > { %s579_s26 = sshll.u32 %s2980_s13, 4  ;;  %s609_s18 = sshll.u32 %s2981_s12, 4  ;;  %s580_s26 = int_to_ptr.vmem [resolvable:$true] %s579_s26  ;;  %s610_s18 = int_to_ptr.vmem [resolvable:$true] %s609_s18 }
  0x29   : > { %s643_s0 = sshll.u32 %s3554_s17, 4  ;;  %s669_s6 = sshll.u32 %s3557_s20, 4  ;;  %s644_s0 = int_to_ptr.hbm [resolvable:$true] %s643_s0  ;;  %s670_s6 = int_to_ptr.hbm [resolvable:$true] %s669_s6 }
  0x2a   : > { %2467 = dma.hbm_to_vmem [thread:$0]  (!%p3149_p5), %s608_s23, 32, %s610_s18, [#allocation8]  }
  0x2b   : > { %s577_s1 = sshll.u32 %s3596_s7, 4  ;;  %s2982_s25 = smov [#allocation12]   ;;  %s578_s1 = int_to_ptr.hbm [resolvable:$true] %s577_s1 }
  0x2c   : > { %2461 = dma.hbm_to_vmem [thread:$0]  (!%p3149_p5), %s578_s1, 32, %s580_s26, [#allocation5]  }
  0x2d   : > { %s645_s27 = sshll.u32 %s2982_s25, 4  ;;  %s2983_s1 = smov [#allocation15]   ;;  %s646_s27 = int_to_ptr.vmem [resolvable:$true] %s645_s27 }
  0x2e   : > { %2473 = dma.hbm_to_vmem [thread:$0]  (!%p3149_p5), %s644_s0, 32, %s646_s27, [#allocation11]  }
  0x2f   : > { %s671_s13 = sshll.u32 %s2983_s1, 4  ;;  %s2984_s23 = smov 64   ;;  %s672_s13 = int_to_ptr.vmem [resolvable:$true] %s671_s13 }
  0x30   : > { %s2985_s26 = smov 4   ;;  %s684_s15 = sshll.u32 %s3558_s21, 4  ;;  %s685_s15 = int_to_ptr.hbm [resolvable:$true] %s684_s15 }
  0x31   : > { %2479 = dma.hbm_to_vmem [thread:$0]  (!%p3149_p5), %s670_s6, 512, %s672_s13, [#allocation14], %s2984_s23, %s2984_s23, %s2985_s26  }
  0x32   : > { %s2986_s2 = smov [#allocation16]   ;;  %s3193_s9 = sadd.s32 1, %s2974_s30  }
  0x33   : > { %s686_s0 = sshll.u32 %s2986_s2, 4  ;;  %s44_s22 = ssub.s32 %s2974_s30, %s3193_s9  ;;  %s687_s0 = int_to_ptr.vmem [resolvable:$true] %s686_s0 }
  0x34   : > { %2482 = dma.hbm_to_vmem [thread:$0]  (!%p3149_p5), %s685_s15, 16, %s687_s0, [#allocation17]  }
  0x35   : > { %s47_s25 = sadd.s32 1, %s2970_s29  ;;  %p45_p6 = scmp.eq.s32.totalorder %s44_s22, 0 }
  0x36   : > { %p54_p7 = scmp.ne.s32.totalorder %s2970_s29, %s2966_s28  ;;  %p55_p8 = scmp.eq.s32.totalorder %s2974_s30, 0 }
  0x37   : > { %p60_p9 = scmp.ne.s32.totalorder %s2966_s28, %s2962_s3  ;;  %p2496_p12 = scmp.lt.s32.totalorder %s2974_s30, 2 }
  0x38   : > { %s3204_s6 = scalar_select %p45_p6, %s2970_s29, %s47_s25  }
  0x39   : > { %p56_p10 = por %p55_p8, %p54_p7  ;;  %p3208_p11 = por %p61_p1, %p60_p9 }
  0x3a   : > { %s697_s4 = sand.u32 1, %s2970_s29   ;;  %s2174_s13 = sshll.u32 %s2974_s30, 3 }
  0x3b   : > { %s2173_s1 = sshll.u32 %s697_s4, 3  ;;  %s3598_s12 = sld [smem:[#allocation24_spill]] }
  0x3c   : > { %s701_s15 = scalar_lea.vmem [#allocation2], %s2173_s1  ;;  %p3218_p13 = pnand %p2496_p12, %p56_p10 }
  0x3d   : > { %s709_s2 = sshll.u32 %s701_s15, 4  ;;  %s698_s22 = scalar_lea.sflag [#allocation3], %s697_s4  ;;  %s710_s2 = int_to_ptr.vmem [resolvable:$true] %s709_s2 }
  0x3e   : > { %p2894_p2 = pneg %p3218_p13 }
  0x41   : > { %s705_s18 = scalar_lea.hbm %s3598_s12, %s2174_s13  ;;  %s2897_s13 = scalar_lea.hbm %s3598_s12, 16 }
  0x42   : > { %s707_s0 = sshll.u32 %s705_s18, 4  ;;  %s708_s0 = int_to_ptr.hbm [resolvable:$true] %s707_s0 }
  0x43   : > { %s2890_s25 = sshra.s32 %s708_s0, 4  ;;  %s2891_s25 = int_to_ptr.hbm [resolvable:$true] %s2890_s25 }
  0x44   : > { %s2892_s7 = scalar_lea.hbm %s2891_s25, 8  ;;  %p2898_p6 = scmp.lt.s32.totalorder %s2891_s25, %s3598_s12 }
  0x45   : > { %p2893_p0 = scmp.ne.s32.totalorder %s2891_s25, %s2892_s7  ;;  %p2899_p7 = scmp.lt.s32.totalorder %s2897_s13, %s2892_s7 }
  0x47   : > { %p2895_p4 = pnand %p2894_p2, %p2893_p0  ;;  %p2900_p8 = por %p2899_p7, %p2898_p6 }
  0x49   : > { %p2896_p5 = pneg %p2895_p4 }
  0x4b   : > { %p2901_p9 = pnand %p2900_p8, %p2896_p5 }
  0x4d   : > { %2904 = shalt.err (!%p2901_p9)
}
  0x4e   : > { %2486 = dma.hbm_to_vmem [thread:$0]  (!%p3218_p13), %s708_s0, 128, %s710_s2, %s698_s22  }
  0x4f   : > { %718 = sbr.rel (%p3138_p3) target bundleno = 3599 (0xe0f), region = 108  ;;  %s720_s4 = sand.u32 (!%p3138_p3), 1, %s2966_s28  }
  0x50   : > { %s2176_s18 = sshll.u32 (!%p3138_p3), %s720_s4, 3  ;;  %s721_s15 = scalar_lea.sflag (!%p3138_p3), [#allocation3], %s720_s4 }
  0x51   : > { %s724_s30 = scalar_lea.vmem (!%p3138_p3), [#allocation2], %s2176_s18 }
  0x54   : > { %2937 = dma.done.wait (%p3208_p11), %s721_s15, 128  }
  0x55   : > { %2939 = vsyncadd (%p3208_p11), %s721_s15, 4294967168 }
  0x56   : > { %2941 = dma.done.wait (%p61_p1), [#allocation5], 64  }
  0x57   : > { %2943 = vsyncadd (%p61_p1), [#allocation5], 4294967232 }
  0x58   : > { %2945 = dma.done.wait (%p61_p1), [#allocation8], 64  }
  0x59   : > { %2947 = vsyncadd (%p61_p1), [#allocation8], 4294967232 }
  0x5a   : > { %2949 = dma.done.wait (%p61_p1), [#allocation11], 64  }
  0x5b   : > { %2951 = vsyncadd (%p61_p1), [#allocation11], 4294967232 }
  0x5c   : > { %2953 = dma.done.wait (%p61_p1), [#allocation14], 528  }
  0x5d   : > { %2955 = vsyncadd (%p61_p1), [#allocation14], 4294966768 }
  0x5e   : > { %2957 = dma.done.wait (%p61_p1), [#allocation17], 16  }
  0x5f   : > { %2959 = vsyncadd (%p61_p1), [#allocation17], 4294967280  ;;  %vm839_vm0 = vcmask 261120   ;;  %v3259_v0 = vld [vmem:[%s724_s30] sm:$0xff]  ;;  %v2987_v4 = vmov 32.0   ;;  %s3600_s0 = sld [smem:[#allocation28_spill]] }
  0x60   : > { %v840_v1 = vsel %vm839_vm0, %v3259_v0, 0.0  ;;  %v851_v2 = vmul.f32 %v3259_v0, %v3259_v0  ;;  %2578 = vrcp.f32 %v2987_v4  ;;  %v2388_v11 = vld [vmem:[%s3545_s8 + $0x8] sm:$0xff]  ;;  %s3601_s25 = sld [smem:[#allocation30_spill]]  ;;  %v2387_v15 = vld [vmem:[%s3545_s8] sm:$0xff]  ;;  %v2558_v41 = vld [vmem:[#allocation4] ss:$0 sm:$0xff] }
  0x61   : > { %841 = vadd.xlane.f32.xlu0 %v840_v1  ;;  %970 = vmatpush.bf16.msra.mxu2 %v2388_v11  ;;  %s3602_s7 = sld [smem:[#allocation26_spill]]  ;;  %v2559_v42 = vld [vmem:[#allocation6] ss:$0 sm:$0xff]  ;;  %v2560_v47 = vld [vmem:[#allocation7] ss:$0 sm:$0xff]  ;;  %vm980_vm5 = vcmask 64512  }
  0x62   : > { %v852_v3 = vsel %vm839_vm0, %v851_v2, 0.0  ;;  %s3603_s2 = sld [smem:[#allocation27_spill]]  ;;  %vm1015_vm6 = vcmask 1043456   ;;  %s3575_s13 = smov 112   ;;  %vm1222_vm7 = vcmask 130048   ;;  %vm1224_vm8 = vcmask 195584  }
  0x63   : > { %s3604_s1 = sld [smem:[#allocation25_spill]]  ;;  %s3573_s23 = smov 120   ;;  %vm1363_vm12 = vcmask 523264  }
  0x64   : > { %s3571_s26 = smov 104   ;;  %s3570_s4 = smov 8  }
  0x65   : > { %v2384_v12 = vld [vmem:[%s3600_s0 + $0x8] sm:$0xff]  ;;  %v2383_v16 = vld [vmem:[%s3600_s0] sm:$0xff]  ;;  %971 = vmatpush.bf16.msra.mxu2 %v2387_v15  ;;  %s3569_s18 = smov 16   ;;  %s3568_s15 = smov 24  }
  0x66   : > { %v2579_v5 = vpop.eup %2578  ;;  %v2386_v13 = vld [vmem:[%s3601_s25 + $0x8] sm:$0xff]  ;;  %904 = vmatpush.bf16.msra.mxu0 %v2384_v12  ;;  %v2385_v17 = vld [vmem:[%s3601_s25] sm:$0xff]  ;;  %s3605_s27 = sld [smem:[#allocation33_spill]]  ;;  %s3607_s24 = smov 112  }
  0x67   : > { %v844_v6 = vmul.f32 32.0, %v2579_v5  ;;  %vm848_vm1 = vweird.f32 %v2579_v5  ;;  %935 = vmatpush.bf16.msra.mxu1 %v2386_v13  ;;  %v2556_v31 = vld [vmem:[%s3602_s7] ss:$0 sm:$0xff]  ;;  %s3608_s3 = smov 120   ;;  %s3609_s22 = smov 104  }
  0x68   : > { %v2557_v34 = vld [vmem:[%s3603_s2] ss:$0 sm:$0xff]  ;;  %s3610_s30 = smov 8   ;;  %p830_p1 = scmp.lt.s32.totalorder %s3133_s5, 1 }
  0x69   : > { %853 = vadd.xlane.f32.xlu0 %v852_v3  ;;  %v845_v7 = vsub.f32 1.0, %v844_v6  ;;  %v3298_v36 = vld [vmem:[%s3604_s1] sm:$0xff]  ;;  %s3606_s1 = sld [smem:[#allocation34_spill]] }
  0x6a   : > { %905 = vmatpush.bf16.msra.mxu0 %v2383_v16  ;;  %s3620_s5 = smov (!%p830_p1, %s3133_s5), 1 }
  0x6b   : > { %v846_v8 = vmul.f32 %v2579_v5, %v845_v7  ;;  %936 = vmatpush.bf16.msra.mxu1 %v2385_v17 }
  0x6d   : > { %v847_v9 = vadd.f32 %v2579_v5, %v846_v8 }
  0x6f   : > { %v3275_v14 = vsel %vm848_vm1, %v2579_v5, %v847_v9 }
  0xd4   : > { %v842_v10 = vpop.xlane.xlu0 %841 }
  0xd5   : > { %v850_v18 = vmul.f32 %v3275_v14, %v842_v10 }
  0xd7   : > { %v856_v20 = vmul.f32 %v850_v18, %v850_v18  ;;  %v858_v30 = vsub.f32 %v3259_v0, %v850_v18 }
  0xdc   : > { %v854_v19 = vpop.xlane.xlu0 %853 }
  0xdd   : > { %v855_v21 = vmul.f32 %v854_v19, %v3275_v14 }
  0xdf   : > { %v857_v22 = vsub.f32 %v855_v21, %v856_v20 }
  0xe1   : > { %v859_v23 = vadd.f32 1e-05, %v857_v22 }
  0xe3   : > { %2580 = vrsqrt.f32 %v859_v23  ;;  %vm866_vm3 = vweird.f32 %v859_v23 }
  0xe9   : > { %v2581_v24 = vpop.eup %2580 }
  0xea   : > { %v861_v25 = vmul.f32 %v2581_v24, %v859_v23  ;;  %vm867_vm2 = vweird.f32 %v2581_v24 }
  0xeb   : > { %vm868_vm4 = vmor %vm866_vm3, %vm867_vm2 }
  0xec   : > { %v862_v26 = vmul.f32 %v2581_v24, %v861_v25 }
  0xee   : > { %v863_v27 = vmul.f32 0.5, %v862_v26 }
  0xf0   : > { %v864_v28 = vsub.f32 1.5, %v863_v27 }
  0xf2   : > { %v865_v29 = vmul.f32 %v2581_v24, %v864_v28 }
  0xf4   : > { %v869_v32 = vsel %vm868_vm4, %v2581_v24, %v865_v29 }
  0xf5   : > { %v870_v33 = vmul.f32 %v869_v32, %v858_v30 }
  0xf7   : > { %v872_v35 = vmul.f32 %v2556_v31, %v870_v33 }
  0xf9   : > { %v874_v37 = vadd.f32 %v2557_v34, %v872_v35 }
  0xfb   : > { %v947_v38 = vpack.c.bf16 %v874_v37, %v874_v37  ;;  %v875_v39 = vadd.f32 %v874_v37, %v3298_v36 }
  0xfd   : > { %2213 = vmatmul.msk.bf16.vlgmr.msra.gmra.mxu2 %vm839_vm0, %v947_v38  ;;  %v881_v40 = vpack.c.bf16 %v875_v39, %v875_v39 }
  0xff   : > { %2195 = vmatmul.msk.bf16.vlgmr.msra.gmra.mxu0 %vm839_vm0, %v881_v40  ;;  %2204 = vmatmul.msk.bf16.vlgmr.msra.gmra.mxu1 %vm839_vm0, %v881_v40 }
 0x17c   : > { %v907_v43 = vpop.f32.mrf.mxu0  ;;  %v938_v44 = vpop.f32.mrf.mxu1 }
 0x17d   : > { %v908_v45 = vadd.f32 %v2558_v41, %v907_v43  ;;  %v939_v46 = vadd.f32 %v2559_v42, %v938_v44 }
 0x17f   : > { %v977_v48 = vpack.c.bf16 %v908_v45, %v908_v45  ;;  %v978_v49 = vpack.c.bf16 %v939_v46, %v939_v46 }
 0x180   : > { %v973_v50 = vpop.f32.mrf.mxu2 }
 0x181   : > { %v1033_v51 = vunpack.c.l.b16 %v977_v48  ;;  %v1038_v52 = vunpack.c.l.b16 %v978_v49  ;;  %v974_v53 = vadd.f32 %v2560_v47, %v973_v50  ;;  %v985_v54 = vsel %vm980_vm5, %v978_v49, 0 }
 0x182   : > { %994 = vmatpush.bf16.xpose.msra.mxu3 %v985_v54 }
 0x183   : > { %v1034_v55 = vpack.c.b16 %v1033_v51, %v1033_v51  ;;  %v1039_v56 = vpack.c.b16 %v1038_v52, %v1038_v52  ;;  %v3305_v57 = vpack.c.bf16 %v974_v53, %v974_v53 }
 0x184   : > { %v909_v58 = vpop.f32.mrf.mxu0  ;;  %v940_v59 = vpop.f32.mrf.mxu1 }
 0x185   : > { %1099 = vrot.lane.b32.xlu2 %v1039_v56, %s3575_s13  ;;  %1040 = vrot.lane.b32.xlu1 %v1039_v56, %s3573_s23  ;;  %v1017_v60 = vsel %vm1015_vm6, %v3305_v57, 0  ;;  %v1074_v46 = vunpack.c.l.b16 %v3305_v57 }
 0x186   : > { %1097 = vrot.lane.b32.xlu0 %v1034_v55, %s3575_s13  ;;  %1026 = vmatpush.bf16.msrb.mxu0 %v1017_v60 }
 0x187   : > { %v1075_v47 = vpack.c.b16 %v1074_v46, %v1074_v46 }
 0x188   : > { %v975_v61 = vpop.f32.mrf.mxu2 }
 0x189   : > { %2214 = vmatmul.msk.bf16.vlgmr.msra.gmra.mxu3 %vm980_vm5, %v977_v48 }
 0x18d   : > { %1155 = vrot.lane.b32.xlu2 %v1039_v56, %s3571_s26  ;;  %1035 = vrot.lane.b32.xlu1 %v1034_v55, %s3573_s23 }
 0x195   : > { %1153 = vrot.lane.b32.xlu1 %v1034_v55, %s3571_s26 }
 0x1df   : > { %v1100_v62 = vpop.permute.xlu2 %1099 }
 0x1e0   : > { %v1105_v63 = vsel %vm980_vm5, %v1100_v62, 0 }
 0x1e1   : > { %1114 = vmatpush.bf16.xpose.msrb.mxu3 %v1105_v63 }
 0x1e7   : > { %v1156_v1 = vpop.permute.xlu2 %1155 }
 0x1e8   : > { %v1161_v5 = vsel %vm980_vm5, %v1156_v1, 0 }
 0x1f7   : > { %v1041_v2 = vpop.permute.xlu1 %1040 }
 0x1f8   : > { %v1098_v3 = vpop.permute.xlu0 %1097  ;;  %v1046_v4 = vsel %vm980_vm5, %v1041_v2, 0 }
 0x1f9   : > { %2218 = vmatmul.msk.bf16.vlgmr.msrb.gmra.mxu3 %vm980_vm5, %v1098_v3  ;;  %1055 = vmatpush.bf16.xpose.msrb.mxu1 %v1046_v4 }
 0x1ff   : > { %v1036_v6 = vpop.permute.xlu1 %1035 }
 0x200   : > { %2216 = vmatmul.msk.bf16.vlgmr.msrb.gmra.mxu1 %vm980_vm5, %v1036_v6 }
 0x201   : > { %1170 = vmatpush.bf16.xpose.msra.mxu1 %v1161_v5 }
 0x207   : > { %v1154_v9 = vpop.permute.xlu1 %1153 }
 0x20c   : > { %v996_v7 = vpop.f32.mrf.mxu3 }
 0x20d   : > { %v1000_v8 = vsel %vm980_vm5, %v996_v7, -inf }
 0x20e   : > { %1001 = vmax.xlane.f32.xlu1 %v1000_v8 }
 0x210   : > { %2220 = vmatmul.msk.bf16.vlgmr.msra.gmra.mxu1 %vm980_vm5, %v1154_v9 }
 0x214   : > { %v998_v10 = vpop.f32.mrf.mxu3 }
 0x27c   : > { %v1116_v11 = vpop.f32.mrf.mxu3 }
 0x27d   : > { %v1057_v12 = vpop.f32.mrf.mxu1  ;;  %v1120_v20 = vsel %vm980_vm5, %v1116_v11, -inf }
 0x27e   : > { %v1061_v13 = vsel %vm980_vm5, %v1057_v12, -inf }
 0x27f   : > { %1062 = vmax.xlane.f32.xlu2 %v1061_v13 }
 0x281   : > { %v1002_v15 = vpop.xlane.xlu1 %1001 }
 0x282   : > { %v1003_v16 = vsub.f32 %v996_v7, %v1002_v15 }
 0x284   : > { %v1004_v17 = vmul.f32 1.442695, %v1003_v16  ;;  %v1118_v18 = vpop.f32.mrf.mxu3 }
 0x285   : > { %v1059_v19 = vpop.f32.mrf.mxu1 }
 0x286   : > { %2582 = vpow2.f32 %v1004_v17 }
 0x287   : > { %1121 = vmax.xlane.f32.xlu2 %v1120_v20 }
 0x28c   : > { %v2583_v21 = vpop.eup %2582 }
 0x28d   : > { %v1172_v22 = vpop.f32.mrf.mxu1  ;;  %v1006_v23 = vsel %vm980_vm5, %v2583_v21, 0.0 }
 0x28e   : > { %1007 = vadd.xlane.f32.xlu1 %v1006_v23  ;;  %v1176_v24 = vsel %vm980_vm5, %v1172_v22, -inf }
 0x28f   : > { %1177 = vmax.xlane.f32.xlu0 %v1176_v24 }
 0x295   : > { %v1174_v25 = vpop.f32.mrf.mxu1 }
 0x2f2   : > { %v1063_v26 = vpop.xlane.xlu2 %1062 }
 0x2f3   : > { %v1064_v27 = vsub.f32 %v1057_v12, %v1063_v26  ;;  %v2389_v12 = vld [vmem:[%s3547_s10] sm:$0xff] }
 0x2f5   : > { %v1065_v28 = vmul.f32 1.442695, %v1064_v27 }
 0x2f7   : > { %2584 = vpow2.f32 %v1065_v28 }
 0x2fa   : > { %v1122_v29 = vpop.xlane.xlu2 %1121 }
 0x2fb   : > { %v1123_v30 = vsub.f32 %v1116_v11, %v1122_v29  ;;  %v2390_v11 = vld [vmem:[%s3547_s10 + $0x8] sm:$0xff] }
 0x2fc   : > { %1254 = vmatpush.bf16.msra.mxu3 %v2390_v11  ;;  %v2392_v29 = vld [vmem:[%s3551_s14 + $0x8] sm:$0xff]  ;;  %v2397_v11 = vld [vmem:[%s3600_s0 + $0x10] sm:$0xff] }
 0x2fd   : > { %v2585_v31 = vpop.eup %2584  ;;  %v1124_v32 = vmul.f32 1.442695, %v1123_v30  ;;  %v2391_v30 = vld [vmem:[%s3551_s14] sm:$0xff] }
 0x2fe   : > { %v1067_v33 = vsel %vm980_vm5, %v2585_v31, 0.0 }
 0x2ff   : > { %2586 = vpow2.f32 %v1124_v32  ;;  %1068 = vadd.xlane.f32.xlu2 %v1067_v33 }
 0x300   : > { %1255 = vmatpush.bf16.msra.mxu3 %v2389_v12  ;;  %v2399_v12 = vld [vmem:[%s3601_s25 + $0x10] sm:$0xff] }
 0x301   : > { %v1008_v34 = vpop.xlane.xlu1 %1007 }
 0x302   : > { %2588 = vrcp.f32 %v1008_v34  ;;  %v1178_v35 = vpop.xlane.xlu0 %1177 }
 0x303   : > { %v1179_v37 = vsub.f32 %v1172_v22, %v1178_v35  ;;  %v2396_v35 = vld [vmem:[%s3553_s16 + $0x18] sm:$0xff] }
 0x304   : > { %1371 = vmatpush.bf16.msrb.mxu1 %v2396_v35 }
 0x305   : > { %v2587_v38 = vpop.eup %2586  ;;  %v1180_v39 = vmul.f32 1.442695, %v1179_v37 }
 0x306   : > { %v1126_v40 = vsel %vm980_vm5, %v2587_v38, 0.0 }
 0x307   : > { %2590 = vpow2.f32 %v1180_v39  ;;  %1127 = vadd.xlane.f32.xlu0 %v1126_v40 }
 0x308   : > { %v2589_v41 = vpop.eup %2588 }
 0x309   : > { %v1010_v42 = vmul.f32 %v2589_v41, %v2583_v21  ;;  %v2561_v21 = vld [vmem:[#allocation9] ss:$0 sm:$0xff] }
 0x30b   : > { %v1011_v43 = vpack.c.bf16 %v1010_v42, %v1010_v42 }
 0x30d   : > { %v2591_v44 = vpop.eup %2590  ;;  %2215 = vmatmul.msk.bf16.vlgmr.msrb.gmra.mxu0 %vm980_vm5, %v1011_v43 }
 0x30e   : > { %v1182_v45 = vsel %vm980_vm5, %v2591_v44, 0.0 }
 0x30f   : > { %1183 = vadd.xlane.f32.xlu1 %v1182_v45 }
 0x317   : > { %1076 = vrot.lane.b32.xlu2 %v1075_v47, %s3573_s23 }
 0x31b   : > { %1132 = vrot.lane.b32.xlu0 %v1075_v47, %s3575_s13 }
 0x328   : > { %1188 = vrot.lane.b32.xlu1 %v1075_v47, %s3571_s26  ;;  %v2562_v47 = vld [vmem:[%s3605_s27] ss:$0 sm:$0xff]  ;;  %s3613_s26 = sld [smem:[#allocation36_spill]] }
 0x372   : > { %v1069_v48 = vpop.xlane.xlu2 %1068 }
 0x373   : > { %2592 = vrcp.f32 %v1069_v48 }
 0x379   : > { %v2593_v49 = vpop.eup %2592 }
 0x37a   : > { %v1071_v50 = vmul.f32 %v2593_v49, %v2585_v31  ;;  %v1077_v51 = vpop.permute.xlu2 %1076  ;;  %v1128_v54 = vpop.xlane.xlu0 %1127 }
 0x37b   : > { %v1082_v52 = vsel %vm1015_vm6, %v1077_v51, 0  ;;  %2594 = vrcp.f32 %v1128_v54  ;;  %v2394_v54 = vld [vmem:[%s3553_s16 + $0x8] sm:$0xff] }
 0x37c   : > { %1091 = vmatpush.bf16.msrb.mxu2 %v1082_v52  ;;  %v1072_v53 = vpack.c.bf16 %v1071_v50, %v1071_v50  ;;  %v2563_v50 = vld [vmem:[%s3606_s1] ss:$0 sm:$0xff] }
 0x37f   : > { %2217 = vmatmul.msk.bf16.vlgmr.msrb.gmra.mxu2 %vm980_vm5, %v1072_v53 }
 0x381   : > { %v2595_v55 = vpop.eup %2594 }
 0x382   : > { %v1130_v57 = vmul.f32 %v2595_v55, %v2587_v38  ;;  %v1184_v58 = vpop.xlane.xlu1 %1183  ;;  %v2395_v38 = vld [vmem:[%s3553_s16 + $0x10] sm:$0xff]  ;;  %v2393_v55 = vld [vmem:[%s3553_s16] sm:$0xff] }
 0x383   : > { %2596 = vrcp.f32 %v1184_v58  ;;  %1372 = vmatpush.bf16.msrb.mxu1 %v2395_v38 }
 0x384   : > { %v1131_v61 = vpack.c.bf16 %v1130_v57, %v1130_v57 }
 0x387   : > { %1373 = vmatpush.bf16.msrb.mxu1 %v2394_v54 }
 0x389   : > { %v2597_v63 = vpop.eup %2596 }
 0x38a   : > { %v1028_v56 = vpop.f32.mrf.mxu0  ;;  %v1186_v1 = vmul.f32 %v2597_v63, %v2591_v44 }
 0x38b   : > { %1374 = vmatpush.bf16.msrb.mxu1 %v2393_v55 }
 0x38c   : > { %v1187_v4 = vpack.c.bf16 %v1186_v1, %v1186_v1 }
 0x38d   : > { %v1133_v59 = vpop.permute.xlu0 %1132 }
 0x38e   : > { %v1138_v60 = vsel %vm1015_vm6, %v1133_v59, 0 }
 0x38f   : > { %1147 = vmatpush.bf16.msra.mxu0 %v1138_v60 }
 0x392   : > { %v1030_v62 = vpop.f32.mrf.mxu0  ;;  %2219 = vmatmul.msk.bf16.vlgmr.msra.gmra.mxu0 %vm980_vm5, %v1131_v61 }
 0x393   : > { %1320 = vmatpush.bf16.msrb.mxu0 %v2392_v29  ;;  %v2565_v62 = vld [vmem:[#allocation12] ss:$0 sm:$0xff] }
 0x397   : > { %1321 = vmatpush.bf16.msrb.mxu0 %v2391_v30 }
 0x39a   : > { %v1189_v2 = vpop.permute.xlu1 %1188 }
 0x39b   : > { %v1194_v3 = vsel %vm1015_vm6, %v1189_v2, 0 }
 0x39c   : > { %1203 = vmatpush.bf16.msra.mxu2 %v1194_v3 }
 0x39f   : > { %2221 = vmatmul.msk.bf16.vlgmr.msra.gmra.mxu2 %vm980_vm5, %v1187_v4 }
 0x402   : > { %v1093_v5 = vpop.f32.mrf.mxu2 }
 0x403   : > { %1210 = vrot.lane.b32.xlu2 %v1093_v5, %s3570_s4  ;;  %s3611_s4 = smov 16  }
 0x40a   : > { %v1095_v6 = vpop.f32.mrf.mxu2 }
 0x40f   : > { %v1149_v7 = vpop.f32.mrf.mxu0 }
 0x410   : > { %1214 = vrot.lane.b32.xlu2 %v1149_v7, %s3569_s18  ;;  %v2402_v7 = vld [vmem:[%s3545_s8 + $0x18] sm:$0xff]  ;;  %s3612_s18 = smov 24  }
 0x411   : > { %1509 = vmatpush.bf16.msra.mxu0 %v2402_v7 }
 0x417   : > { %v1151_v8 = vpop.f32.mrf.mxu0 }
 0x418   : > { %v2398_v8 = vld [vmem:[%s3600_s0 + $0x18] sm:$0xff] }
 0x419   : > { %1441 = vmatpush.bf16.msrb.mxu2 %v2398_v8 }
 0x41d   : > { %1442 = vmatpush.bf16.msrb.mxu2 %v2397_v11 }
 0x422   : > { %v1205_v9 = vpop.f32.mrf.mxu2 }
 0x423   : > { %1218 = vrot.lane.b32.xlu0 %v1205_v9, %s3568_s15  ;;  %v2400_v9 = vld [vmem:[%s3601_s25 + $0x18] sm:$0xff] }
 0x424   : > { %1473 = vmatpush.bf16.msrb.mxu3 %v2400_v9 }
 0x428   : > { %1474 = vmatpush.bf16.msrb.mxu3 %v2399_v12 }
 0x42a   : > { %v1207_v10 = vpop.f32.mrf.mxu2 }
 0x42b   : > { %v2401_v10 = vld [vmem:[%s3545_s8 + $0x10] sm:$0xff] }
 0x42c   : > { %1510 = vmatpush.bf16.msra.mxu0 %v2401_v10 }
 0x45d   : > { %v1211_v13 = vpop.permute.xlu2 %1210 }
 0x45e   : > { %v1221_v16 = vsel %vm980_vm5, %v1028_v56, %v1211_v13  ;;  %v2564_v56 = vld [vmem:[#allocation10] ss:$0 sm:$0xff] }
 0x46a   : > { %v1215_v15 = vpop.permute.xlu2 %1214 }
 0x46b   : > { %v1223_v17 = vsel %vm1222_vm7, %v1221_v16, %v1215_v15 }
 0x495   : > { %v1219_v18 = vpop.permute.xlu0 %1218 }
 0x496   : > { %v1225_v19 = vsel %vm1224_vm8, %v1223_v17, %v1219_v18 }
 0x497   : > { %v1231_v20 = vpack.c.bf16 %v1225_v19, %v1225_v19 }
 0x499   : > { %2230 = vmatmul.msk.bf16.vlgmr.msra.gmra.mxu3 %vm839_vm0, %v1231_v20 }
 0x51c   : > { %v1257_v22 = vpop.f32.mrf.mxu3 }
 0x51d   : > { %v1258_v23 = vadd.f32 %v2561_v21, %v1257_v22 }
 0x51f   : > { %v1261_v24 = vadd.f32 %v1258_v23, %v3259_v0 }
 0x521   : > { %v1264_v25 = vsel %vm839_vm0, %v1261_v24, 0.0  ;;  %v1268_v26 = vmul.f32 %v1261_v24, %v1261_v24 }
 0x522   : > { %1265 = vadd.xlane.f32.xlu1 %v1264_v25 }
 0x523   : > { %v1269_v27 = vsel %vm839_vm0, %v1268_v26, 0.0 }
 0x524   : > { %v1259_v28 = vpop.f32.mrf.mxu3  ;;  %1270 = vadd.xlane.f32.xlu2 %v1269_v27 }
 0x525   : > { %v2566_v28 = vld [vmem:[%s3602_s7 + $0x1] ss:$0 sm:$0xff] }
 0x595   : > { %v1266_v31 = vpop.xlane.xlu1 %1265 }
 0x596   : > { %v1267_v0 = vmul.f32 %v1266_v31, %v3275_v14  ;;  %v2567_v31 = vld [vmem:[%s3603_s2 + $0x1] ss:$0 sm:$0xff] }
 0x597   : > { %v1271_v32 = vpop.xlane.xlu2 %1270 }
 0x598   : > { %v1273_v33 = vmul.f32 %v1267_v0, %v1267_v0  ;;  %v1272_v34 = vmul.f32 %v1271_v32, %v3275_v14  ;;  %v1275_v46 = vsub.f32 %v1261_v24, %v1267_v0 }
 0x59a   : > { %v1274_v37 = vsub.f32 %v1272_v34, %v1273_v33 }
 0x59c   : > { %v1276_v39 = vadd.f32 1e-05, %v1274_v37  ;;  %v2568_v37 = vld [vmem:[#allocation7 + $0x1] ss:$0 sm:$0xff] }
 0x59e   : > { %2598 = vrsqrt.f32 %v1276_v39  ;;  %vm1283_vm10 = vweird.f32 %v1276_v39 }
 0x5a4   : > { %v2599_v40 = vpop.eup %2598 }
 0x5a5   : > { %v1278_v41 = vmul.f32 %v2599_v40, %v1276_v39  ;;  %vm1284_vm9 = vweird.f32 %v2599_v40 }
 0x5a6   : > { %vm1285_vm11 = vmor %vm1283_vm10, %vm1284_vm9 }
 0x5a7   : > { %v1279_v42 = vmul.f32 %v2599_v40, %v1278_v41 }
 0x5a9   : > { %v1280_v43 = vmul.f32 0.5, %v1279_v42  ;;  %v2569_v42 = vld [vmem:[#allocation4 + $0x1] ss:$0 sm:$0xff] }
 0x5ab   : > { %v1281_v44 = vsub.f32 1.5, %v1280_v43  ;;  %v2570_v43 = vld [vmem:[#allocation6 + $0x1] ss:$0 sm:$0xff] }
 0x5ad   : > { %v1282_v45 = vmul.f32 %v2599_v40, %v1281_v44 }
 0x5af   : > { %v1286_v48 = vsel %vm1285_vm11, %v2599_v40, %v1282_v45 }
 0x5b0   : > { %v1287_v49 = vmul.f32 %v1286_v48, %v1275_v46 }
 0x5b2   : > { %v1289_v51 = vmul.f32 %v2562_v47, %v1287_v49 }
 0x5b4   : > { %v1291_v52 = vadd.f32 %v2563_v50, %v1289_v51 }
 0x5b6   : > { %v1297_v53 = vpack.c.bf16 %v1291_v52, %v1291_v52 }
 0x5b8   : > { %2239 = vmatmul.msk.bf16.vlgmr.msrb.gmra.mxu0 %vm839_vm0, %v1297_v53 }
 0x635   : > { %v1323_v57 = vpop.f32.mrf.mxu0 }
 0x636   : > { %v1324_v58 = vadd.f32 %v2564_v56, %v1323_v57 }
 0x638   : > { %v1327_v59 = vmax.f32 %v1324_v58, 0.0 }
 0x63a   : > { %v1337_v60 = vpack.c.bf16 %v1327_v59, %v1327_v59 }
 0x63c   : > { %2256 = vmatmul.msk.bf16.vlgmr.msrb.gmra.mxu1 %vm1363_vm12, %v1337_v60 }
 0x63d   : > { %v1325_v61 = vpop.f32.mrf.mxu0 }
 0x6b9   : > { %v1376_v63 = vpop.f32.mrf.mxu1 }
 0x6ba   : > { %v1377_v1 = vadd.f32 %v2565_v62, %v1376_v63 }
 0x6bc   : > { %v3385_v2 = vadd.f32 %v1377_v1, %v1261_v24 }
 0x6be   : > { %v1383_v3 = vsel %vm839_vm0, %v3385_v2, 0.0  ;;  %v1387_v4 = vmul.f32 %v3385_v2, %v3385_v2 }
 0x6bf   : > { %1384 = vadd.xlane.f32.xlu0 %v1383_v3 }
 0x6c0   : > { %v1388_v5 = vsel %vm839_vm0, %v1387_v4, 0.0 }
 0x6c1   : > { %v1378_v6 = vpop.f32.mrf.mxu1  ;;  %1389 = vadd.xlane.f32.xlu1 %v1388_v5 }
 0x732   : > { %v1385_v13 = vpop.xlane.xlu0 %1384 }
 0x733   : > { %v1386_v15 = vmul.f32 %v1385_v13, %v3275_v14 }
 0x734   : > { %v1390_v16 = vpop.xlane.xlu1 %1389 }
 0x735   : > { %v1392_v17 = vmul.f32 %v1386_v15, %v1386_v15  ;;  %v1391_v18 = vmul.f32 %v1390_v16, %v3275_v14  ;;  %v1394_v27 = vsub.f32 %v3385_v2, %v1386_v15 }
 0x737   : > { %v1393_v19 = vsub.f32 %v1391_v18, %v1392_v17 }
 0x739   : > { %v1395_v20 = vadd.f32 1e-05, %v1393_v19 }
 0x73b   : > { %2600 = vrsqrt.f32 %v1395_v20  ;;  %vm1402_vm14 = vweird.f32 %v1395_v20 }
 0x741   : > { %v2601_v21 = vpop.eup %2600 }
 0x742   : > { %v1397_v22 = vmul.f32 %v2601_v21, %v1395_v20  ;;  %vm1403_vm13 = vweird.f32 %v2601_v21 }
 0x743   : > { %vm1404_vm15 = vmor %vm1402_vm14, %vm1403_vm13 }
 0x744   : > { %v1398_v23 = vmul.f32 %v2601_v21, %v1397_v22 }
 0x746   : > { %v1399_v24 = vmul.f32 0.5, %v1398_v23 }
 0x748   : > { %v1400_v25 = vsub.f32 1.5, %v1399_v24 }
 0x74a   : > { %v1401_v26 = vmul.f32 %v2601_v21, %v1400_v25 }
 0x74c   : > { %v1405_v29 = vsel %vm1404_vm15, %v2601_v21, %v1401_v26 }
 0x74d   : > { %v1406_v30 = vmul.f32 %v1405_v29, %v1394_v27 }
 0x74f   : > { %v1408_v0 = vmul.f32 %v2566_v28, %v1406_v30 }
 0x751   : > { %v1410_v32 = vadd.f32 %v2567_v31, %v1408_v0 }
 0x753   : > { %v1486_v33 = vpack.c.bf16 %v1410_v32, %v1410_v32  ;;  %v1411_v34 = vadd.f32 %v1410_v32, %v3298_v36 }
 0x755   : > { %2295 = vmatmul.msk.bf16.vlgmr.msra.gmra.mxu0 %vm839_vm0, %v1486_v33  ;;  %v1418_v35 = vpack.c.bf16 %v1411_v34, %v1411_v34 }
 0x757   : > { %2269 = vmatmul.msk.bf16.vlgmr.msrb.gmra.mxu2 %vm839_vm0, %v1418_v35  ;;  %2282 = vmatmul.msk.bf16.vlgmr.msrb.gmra.mxu3 %vm839_vm0, %v1418_v35 }
 0x7d2   : > { %v1512_v38 = vpop.f32.mrf.mxu0 }
 0x7d3   : > { %v1513_v39 = vadd.f32 %v2568_v37, %v1512_v38 }
 0x7d5   : > { %v3423_v40 = vpack.c.bf16 %v1513_v39, %v1513_v39 }
 0x7d7   : > { %v1554_v41 = vsel %vm1015_vm6, %v3423_v40, 0  ;;  %v1611_v22 = vunpack.c.l.b16 %v3423_v40 }
 0x7d8   : > { %1563 = vmatpush.bf16.msra.mxu2 %v1554_v41 }
 0x7d9   : > { %v1612_v23 = vpack.c.b16 %v1611_v22, %v1611_v22 }
 0x7da   : > { %v1444_v44 = vpop.f32.mrf.mxu2  ;;  %v1476_v36 = vpop.f32.mrf.mxu3 }
 0x7db   : > { %v1445_v45 = vadd.f32 %v2569_v42, %v1444_v44  ;;  %v1477_v46 = vadd.f32 %v2570_v43, %v1476_v36  ;;  %v1514_v47 = vpop.f32.mrf.mxu0 }
 0x7dd   : > { %v1516_v48 = vpack.c.bf16 %v1445_v45, %v1445_v45  ;;  %v1517_v49 = vpack.c.bf16 %v1477_v46, %v1477_v46 }
 0x7df   : > { %v1570_v50 = vunpack.c.l.b16 %v1516_v48  ;;  %v1523_v51 = vsel %vm980_vm5, %v1517_v49, 0  ;;  %v1575_v52 = vunpack.c.l.b16 %v1517_v49 }
 0x7e0   : > { %1532 = vmatpush.bf16.xpose.msra.mxu1 %v1523_v51 }
 0x7e1   : > { %v1571_v53 = vpack.c.b16 %v1570_v50, %v1570_v50  ;;  %v1576_v54 = vpack.c.b16 %v1575_v52, %v1575_v52 }
 0x7e2   : > { %v1446_v55 = vpop.f32.mrf.mxu2  ;;  %v1478_v56 = vpop.f32.mrf.mxu3 }
 0x7e3   : > { %1636 = vrot.lane.b32.xlu1 %v1576_v54, %s3607_s24  ;;  %1577 = vrot.lane.b32.xlu2 %v1576_v54, %s3608_s3 }
 0x7e4   : > { %1572 = vrot.lane.b32.xlu0 %v1571_v53, %s3608_s3 }
 0x7e7   : > { %2296 = vmatmul.msk.bf16.vlgmr.msra.gmra.mxu1 %vm980_vm5, %v1516_v48 }
 0x7eb   : > { %1690 = vrot.lane.b32.xlu1 %v1571_v53, %s3609_s22  ;;  %1634 = vrot.lane.b32.xlu2 %v1571_v53, %s3607_s24 }
 0x7ec   : > { %1692 = vrot.lane.b32.xlu0 %v1576_v54, %s3609_s22 }
 0x83d   : > { %v1578_v57 = vpop.permute.xlu2 %1577 }
 0x83e   : > { %v1583_v58 = vsel %vm980_vm5, %v1578_v57, 0 }
 0x83f   : > { %1592 = vmatpush.bf16.xpose.msra.mxu3 %v1583_v58 }
 0x845   : > { %v1635_v62 = vpop.permute.xlu2 %1634 }
 0x855   : > { %v1637_v59 = vpop.permute.xlu1 %1636 }
 0x856   : > { %v1642_v60 = vsel %vm980_vm5, %v1637_v59, 0  ;;  %v1573_v61 = vpop.permute.xlu0 %1572 }
 0x857   : > { %2298 = vmatmul.msk.bf16.vlgmr.msra.gmra.mxu3 %vm980_vm5, %v1573_v61  ;;  %1651 = vmatpush.bf16.xpose.msrb.mxu1 %v1642_v60 }
 0x85d   : > { %v1691_v5 = vpop.permute.xlu1 %1690 }
 0x85e   : > { %v1693_v63 = vpop.permute.xlu0 %1692  ;;  %2300 = vmatmul.msk.bf16.vlgmr.msrb.gmra.mxu1 %vm980_vm5, %v1635_v62 }
 0x85f   : > { %v1698_v1 = vsel %vm980_vm5, %v1693_v63, 0 }
 0x860   : > { %1707 = vmatpush.bf16.xpose.msrb.mxu3 %v1698_v1 }
 0x864   : > { %v1534_v3 = vpop.f32.mrf.mxu1 }
 0x865   : > { %v1538_v4 = vsel %vm980_vm5, %v1534_v3, -inf }
 0x866   : > { %1539 = vmax.xlane.f32.xlu0 %v1538_v4 }
 0x867   : > { %2302 = vmatmul.msk.bf16.vlgmr.msrb.gmra.mxu3 %vm980_vm5, %v1691_v5 }
 0x86c   : > { %v1536_v6 = vpop.f32.mrf.mxu1 }
 0x86d   : > { %v2404_v6 = vld [vmem:[%s3547_s10 + $0x18] sm:$0xff] }
 0x86e   : > { %1790 = vmatpush.bf16.msra.mxu1 %v2404_v6 }
 0x8d9   : > { %v1540_v7 = vpop.xlane.xlu0 %1539 }
 0x8da   : > { %v1594_v8 = vpop.f32.mrf.mxu3  ;;  %v1541_v9 = vsub.f32 %v1534_v3, %v1540_v7  ;;  %v2403_v7 = vld [vmem:[%s3547_s10 + $0x10] sm:$0xff] }
 0x8db   : > { %v1598_v10 = vsel %vm980_vm5, %v1594_v8, -inf  ;;  %v1653_v11 = vpop.f32.mrf.mxu1  ;;  %1791 = vmatpush.bf16.msra.mxu1 %v2403_v7 }
 0x8dc   : > { %v1542_v12 = vmul.f32 1.442695, %v1541_v9  ;;  %1599 = vmax.xlane.f32.xlu2 %v1598_v10  ;;  %v1657_v13 = vsel %vm980_vm5, %v1653_v11, -inf }
 0x8dd   : > { %1658 = vmax.xlane.f32.xlu1 %v1657_v13 }
 0x8de   : > { %2602 = vpow2.f32 %v1542_v12 }
 0x8e2   : > { %v1596_v15 = vpop.f32.mrf.mxu3 }
 0x8e3   : > { %v1655_v16 = vpop.f32.mrf.mxu1 }
 0x8e4   : > { %v2603_v17 = vpop.eup %2602  ;;  %v2571_v16 = vld [vmem:[#allocation9 + $0x1] ss:$0 sm:$0xff] }
 0x8e5   : > { %v1544_v18 = vsel %vm980_vm5, %v2603_v17, 0.0 }
 0x8e6   : > { %1545 = vadd.xlane.f32.xlu2 %v1544_v18 }
 0x8ea   : > { %v1709_v19 = vpop.f32.mrf.mxu3 }
 0x8eb   : > { %v1713_v20 = vsel %vm980_vm5, %v1709_v19, -inf }
 0x8ec   : > { %1714 = vmax.xlane.f32.xlu0 %v1713_v20 }
 0x8f2   : > { %v1711_v21 = vpop.f32.mrf.mxu3 }
 0x900   : > { %1613 = vrot.lane.b32.xlu0 %v1612_v23, %s3608_s3  ;;  %s2186_s3 = sshll.u32 %s3620_s5, 3 }
 0x94f   : > { %v1600_v24 = vpop.xlane.xlu2 %1599 }
 0x950   : > { %v1601_v25 = vsub.f32 %v1594_v8, %v1600_v24  ;;  %v1659_v26 = vpop.xlane.xlu1 %1658  ;;  %v2406_v24 = vld [vmem:[%s3551_s14 + $0x18] sm:$0xff] }
 0x951   : > { %v1660_v27 = vsub.f32 %v1653_v11, %v1659_v26 }
 0x952   : > { %v1602_v28 = vmul.f32 1.442695, %v1601_v25 }
 0x953   : > { %v1661_v29 = vmul.f32 1.442695, %v1660_v27 }
 0x954   : > { %2604 = vpow2.f32 %v1602_v28 }
 0x955   : > { %2606 = vpow2.f32 %v1661_v29 }
 0x959   : > { %v1546_v30 = vpop.xlane.xlu2 %1545 }
 0x95a   : > { %v2605_v31 = vpop.eup %2604  ;;  %2608 = vrcp.f32 %v1546_v30  ;;  %v2410_v30 = vld [vmem:[%s3553_s16 + $0x38] sm:$0xff] }
 0x95b   : > { %v2607_v0 = vpop.eup %2606  ;;  %v1604_v32 = vsel %vm980_vm5, %v2605_v31, 0.0  ;;  %1908 = vmatpush.bf16.msra.mxu3 %v2410_v30 }
 0x95c   : > { %1605 = vadd.xlane.f32.xlu1 %v1604_v32  ;;  %v1663_v33 = vsel %vm980_vm5, %v2607_v0, 0.0 }
 0x95d   : > { %1664 = vadd.xlane.f32.xlu2 %v1663_v33 }
 0x95f   : > { %v1715_v34 = vpop.xlane.xlu0 %1714 }
 0x960   : > { %v2609_v35 = vpop.eup %2608  ;;  %v1716_v37 = vsub.f32 %v1709_v19, %v1715_v34 }
 0x961   : > { %v1548_v38 = vmul.f32 %v2609_v35, %v2603_v17 }
 0x962   : > { %v1717_v39 = vmul.f32 1.442695, %v1716_v37 }
 0x963   : > { %v1549_v40 = vpack.c.bf16 %v1548_v38, %v1548_v38 }
 0x964   : > { %2610 = vpow2.f32 %v1717_v39 }
 0x965   : > { %2297 = vmatmul.msk.bf16.vlgmr.msra.gmra.mxu2 %vm980_vm5, %v1549_v40  ;;  %v2572_v40 = vld [vmem:[%s3605_s27 + $0x1] ss:$0 sm:$0xff] }
 0x96a   : > { %v2611_v41 = vpop.eup %2610 }
 0x96b   : > { %v1719_v42 = vsel %vm980_vm5, %v2611_v41, 0.0 }
 0x96c   : > { %1720 = vadd.xlane.f32.xlu1 %v1719_v42 }
 0x972   : > { %v1614_v43 = vpop.permute.xlu0 %1613 }
 0x973   : > { %v1619_v44 = vsel %vm1015_vm6, %v1614_v43, 0  ;;  %v2573_v43 = vld [vmem:[%s3606_s1 + $0x1] ss:$0 sm:$0xff] }
 0x974   : > { %1628 = vmatpush.bf16.msrb.mxu0 %v1619_v44 }
 0x975   : > { %1669 = vrot.lane.b32.xlu2 %v1612_v23, %s3607_s24 }
 0x985   : > { %1725 = vrot.lane.b32.xlu1 %v1612_v23, %s3609_s22 }
 0x9cf   : > { %v1606_v36 = vpop.xlane.xlu1 %1605 }
 0x9d0   : > { %2612 = vrcp.f32 %v1606_v36  ;;  %v1665_v45 = vpop.xlane.xlu2 %1664 }
 0x9d1   : > { %2614 = vrcp.f32 %v1665_v45 }
 0x9d6   : > { %v2613_v46 = vpop.eup %2612 }
 0x9d7   : > { %v2615_v47 = vpop.eup %2614  ;;  %v1608_v48 = vmul.f32 %v2613_v46, %v2605_v31  ;;  %v2408_v46 = vld [vmem:[%s3553_s16 + $0x28] sm:$0xff] }
 0x9d8   : > { %v1667_v49 = vmul.f32 %v2615_v47, %v2607_v0  ;;  %v1670_v50 = vpop.permute.xlu2 %1669  ;;  %v2409_v0 = vld [vmem:[%s3553_s16 + $0x30] sm:$0xff]  ;;  %v2407_v47 = vld [vmem:[%s3553_s16 + $0x20] sm:$0xff] }
 0x9d9   : > { %v1609_v51 = vpack.c.bf16 %v1608_v48, %v1608_v48  ;;  %v1675_v52 = vsel %vm1015_vm6, %v1670_v50, 0  ;;  %1909 = vmatpush.bf16.msra.mxu3 %v2409_v0  ;;  %v2574_v48 = vld [vmem:[#allocation10 + $0x1] ss:$0 sm:$0xff] }
 0x9da   : > { %v1668_v53 = vpack.c.bf16 %v1667_v49, %v1667_v49  ;;  %1684 = vmatpush.bf16.msrb.mxu2 %v1675_v52 }
 0x9db   : > { %2299 = vmatmul.msk.bf16.vlgmr.msrb.gmra.mxu0 %vm980_vm5, %v1609_v51 }
 0x9dd   : > { %2301 = vmatmul.msk.bf16.vlgmr.msrb.gmra.mxu2 %vm980_vm5, %v1668_v53  ;;  %1910 = vmatpush.bf16.msra.mxu3 %v2408_v46 }
 0x9de   : > { %1857 = vmatpush.bf16.msra.mxu2 %v2406_v24 }
 0x9df   : > { %v1721_v55 = vpop.xlane.xlu1 %1720 }
 0x9e0   : > { %2616 = vrcp.f32 %v1721_v55  ;;  %v2411_v55 = vld [vmem:[%s3613_s26] sm:$0xff] }
 0x9e1   : > { %1911 = vmatpush.bf16.msra.mxu3 %v2407_v47 }
 0x9e6   : > { %v2617_v57 = vpop.eup %2616 }
 0x9e7   : > { %v1723_v58 = vmul.f32 %v2617_v57, %v2611_v41  ;;  %v2415_v57 = vld [vmem:[#allocation15 + $0x10] sm:$0xff] }
 0x9e8   : > { %v1565_v54 = vpop.f32.mrf.mxu2 }
 0x9e9   : > { %v1724_v61 = vpack.c.bf16 %v1723_v58, %v1723_v58  ;;  %v2575_v58 = vld [vmem:[#allocation12 + $0x1] ss:$0 sm:$0xff] }
 0x9f0   : > { %v1567_v56 = vpop.f32.mrf.mxu2 }
 0x9f1   : > { %v2416_v56 = vld [vmem:[#allocation15 + $0x18] sm:$0xff] }
 0x9f2   : > { %2000 = vmatpush.bf16.msrb.mxu1 %v2416_v56 }
 0x9f6   : > { %2001 = vmatpush.bf16.msrb.mxu1 %v2415_v57 }
 0x9f7   : > { %v1726_v59 = vpop.permute.xlu1 %1725 }
 0x9f8   : > { %v1731_v60 = vsel %vm1015_vm6, %v1726_v59, 0 }
 0x9f9   : > { %1740 = vmatpush.bf16.msra.mxu0 %v1731_v60 }
 0x9fc   : > { %2303 = vmatmul.msk.bf16.vlgmr.msra.gmra.mxu0 %vm980_vm5, %v1724_v61 }
 0xa58   : > { %v1630_v62 = vpop.f32.mrf.mxu0 }
 0xa59   : > { %1747 = vrot.lane.b32.xlu0 %v1630_v62, %s3610_s30 }
 0xa60   : > { %v1632_v63 = vpop.f32.mrf.mxu0  ;;  %v1686_v1 = vpop.f32.mrf.mxu2 }
 0xa61   : > { %1751 = vrot.lane.b32.xlu0 %v1686_v1, %s3611_s4  ;;  %v2414_v1 = vld [vmem:[#allocation15 + $0x8] sm:$0xff]  ;;  %s3614_s4 = sld [smem:[#allocation37_spill]] }
 0xa62   : > { %2002 = vmatpush.bf16.msrb.mxu1 %v2414_v1 }
 0xa68   : > { %v1688_v3 = vpop.f32.mrf.mxu2 }
 0xa69   : > { %v2413_v3 = vld [vmem:[#allocation15] sm:$0xff] }
 0xa6a   : > { %2003 = vmatpush.bf16.msrb.mxu1 %v2413_v3 }
 0xa79   : > { %v1742_v4 = vpop.f32.mrf.mxu0 }
 0xa7a   : > { %1755 = vrot.lane.b32.xlu2 %v1742_v4, %s3612_s18  ;;  %v2576_v4 = vld [vmem:[#allocation13] ss:$0 sm:$0xff]  ;;  %s833_s18 = scalar_lea.vmem %s3614_s4, %s2186_s3 }
 0xa81   : > { %v1744_v5 = vpop.f32.mrf.mxu0 }
 0xacb   : > { %v1748_v8 = vpop.permute.xlu0 %1747 }
 0xacc   : > { %v1758_v9 = vsel %vm980_vm5, %v1565_v54, %v1748_v8  ;;  %v2412_v54 = vld [vmem:[%s3613_s26 + $0x8] sm:$0xff] }
 0xacd   : > { %1948 = vmatpush.bf16.msrb.mxu0 %v2412_v54 }
 0xad1   : > { %1949 = vmatpush.bf16.msrb.mxu0 %v2411_v55 }
 0xad3   : > { %v1752_v10 = vpop.permute.xlu0 %1751 }
 0xad4   : > { %v1759_v11 = vsel %vm1222_vm7, %v1758_v9, %v1752_v10  ;;  %v1756_v12 = vpop.permute.xlu2 %1755  ;;  %v2577_v10 = vld [vmem:[#allocation16] ss:$0 sm:$0xff] }
 0xad5   : > { %v1760_v13 = vsel %vm1224_vm8, %v1759_v11, %v1756_v12 }
 0xad6   : > { %v1767_v15 = vpack.c.bf16 %v1760_v13, %v1760_v13 }
 0xad8   : > { %2316 = vmatmul.msk.bf16.vlgmr.msra.gmra.mxu1 %vm839_vm0, %v1767_v15 }
 0xb55   : > { %v1793_v17 = vpop.f32.mrf.mxu1 }
 0xb56   : > { %v1794_v18 = vadd.f32 %v2571_v16, %v1793_v17 }
 0xb58   : > { %v3474_v19 = vadd.f32 %v1794_v18, %v3385_v2  ;;  %v2405_v2 = vld [vmem:[%s3551_s14 + $0x10] sm:$0xff] }
 0xb59   : > { %1858 = vmatpush.bf16.msra.mxu2 %v2405_v2 }
 0xb5a   : > { %v1800_v20 = vsel %vm839_vm0, %v3474_v19, 0.0  ;;  %v1804_v21 = vmul.f32 %v3474_v19, %v3474_v19 }
 0xb5b   : > { %1801 = vadd.xlane.f32.xlu0 %v1800_v20 }
 0xb5c   : > { %v1805_v22 = vsel %vm839_vm0, %v1804_v21, 0.0 }
 0xb5d   : > { %v1795_v23 = vpop.f32.mrf.mxu1  ;;  %1806 = vadd.xlane.f32.xlu1 %v1805_v22 }
 0xbce   : > { %v1802_v25 = vpop.xlane.xlu0 %1801 }
 0xbcf   : > { %v1803_v26 = vmul.f32 %v1802_v25, %v3275_v14 }
 0xbd0   : > { %v1807_v27 = vpop.xlane.xlu1 %1806 }
 0xbd1   : > { %v1809_v28 = vmul.f32 %v1803_v26, %v1803_v26  ;;  %v1808_v29 = vmul.f32 %v1807_v27, %v3275_v14  ;;  %v1811_v39 = vsub.f32 %v3474_v19, %v1803_v26 }
 0xbd3   : > { %v1810_v31 = vsub.f32 %v1808_v29, %v1809_v28 }
 0xbd5   : > { %v1812_v32 = vadd.f32 1e-05, %v1810_v31 }
 0xbd7   : > { %2618 = vrsqrt.f32 %v1812_v32  ;;  %vm1819_vm2 = vweird.f32 %v1812_v32 }
 0xbdd   : > { %v2619_v33 = vpop.eup %2618 }
 0xbde   : > { %v1814_v34 = vmul.f32 %v2619_v33, %v1812_v32  ;;  %vm1820_vm1 = vweird.f32 %v2619_v33 }
 0xbdf   : > { %vm1821_vm3 = vmor %vm1819_vm2, %vm1820_vm1 }
 0xbe0   : > { %v1815_v35 = vmul.f32 %v2619_v33, %v1814_v34 }
 0xbe2   : > { %v1816_v37 = vmul.f32 0.5, %v1815_v35 }
 0xbe4   : > { %v1817_v38 = vsub.f32 1.5, %v1816_v37 }
 0xbe6   : > { %v1818_v14 = vmul.f32 %v2619_v33, %v1817_v38 }
 0xbe8   : > { %v1822_v41 = vsel %vm1821_vm3, %v2619_v33, %v1818_v14 }
 0xbe9   : > { %v1823_v42 = vmul.f32 %v1822_v41, %v1811_v39 }
 0xbeb   : > { %v1825_v44 = vmul.f32 %v2572_v40, %v1823_v42 }
 0xbed   : > { %v1827_v36 = vadd.f32 %v2573_v43, %v1825_v44 }
 0xbef   : > { %v1834_v45 = vpack.c.bf16 %v1827_v36, %v1827_v36 }
 0xbf1   : > { %2329 = vmatmul.msk.bf16.vlgmr.msra.gmra.mxu2 %vm839_vm0, %v1834_v45 }
 0xc74   : > { %v1860_v49 = vpop.f32.mrf.mxu2 }
 0xc75   : > { %v1861_v50 = vadd.f32 %v2574_v48, %v1860_v49 }
 0xc77   : > { %v1864_v51 = vmax.f32 %v1861_v50, 0.0 }
 0xc79   : > { %v1875_v52 = vpack.c.bf16 %v1864_v51, %v1864_v51 }
 0xc7b   : > { %2354 = vmatmul.msk.bf16.vlgmr.msra.gmra.mxu3 %vm1363_vm12, %v1875_v52 }
 0xc7c   : > { %v1862_v53 = vpop.f32.mrf.mxu2 }
 0xcfe   : > { %v1913_v59 = vpop.f32.mrf.mxu3 }
 0xcff   : > { %v1914_v60 = vadd.f32 %v2575_v58, %v1913_v59 }
 0xd01   : > { %v1917_v61 = vadd.f32 %v1914_v60, %v3474_v19 }
 0xd03   : > { %v1923_v62 = vpack.c.bf16 %v1917_v61, %v1917_v61 }
 0xd05   : > { %2363 = vmatmul.msk.bf16.vlgmr.msrb.gmra.mxu0 %vm839_vm0, %v1923_v62 }
 0xd06   : > { %v1915_v63 = vpop.f32.mrf.mxu3 }
 0xd82   : > { %v1951_v5 = vpop.f32.mrf.mxu0 }
 0xd83   : > { %v1952_v6 = vadd.f32 %v2576_v4, %v1951_v5 }
 0xd85   : > { %v1955_v7 = vmax.f32 %v1952_v6, 0.0 }
 0xd87   : > { %v1965_v8 = vpack.c.bf16 %v1955_v7, %v1955_v7 }
 0xd89   : > { %2380 = vmatmul.msk.bf16.vlgmr.msrb.gmra.mxu1 %vm1363_vm12, %v1965_v8 }
 0xd8a   : > { %v1953_v9 = vpop.f32.mrf.mxu0 }
 0xe06   : > { %v2005_v11 = vpop.f32.mrf.mxu1 }
 0xe07   : > { %v2006_v12 = vadd.f32 %v2577_v10, %v2005_v11 }
 0xe09   : > { %2009 = vst [vmem:[%s833_s18] sm:$0xff] %v2006_v12 }
 0xe0e   : > { %v2007_v13 = vpop.f32.mrf.mxu1 }
 0xe0f PF: > { %p37_p3 = scmp.ge.s32.totalorder %s3193_s9, 4   ;;  %s3615_s3 = smov %s2966_s28 }
 0xe10   : > { %s3616_s28 = smov %s2970_s29  ;;  %s3617_s29 = smov %s3204_s6 }
 0xe11   : > { %s3618_s30 = smov %s3193_s9  ;;  %39 = sbr.rel (!%p37_p3) target bundleno = 23 (0x17), region = 190 }
 0xe16   :  { %2029 = vsyncpa [#allocation3], 1 }
 0xe17   :  { %2031 = vsyncpa [#allocation3 + $0x1], 1 }
 0xe18   :  { %2032 = vsyncpa [#allocation5], 1 }
 0xe19   :  { %2033 = vsyncpa [#allocation8], 1 }
 0xe1a   :  { %2034 = vsyncpa [#allocation11], 1 }
 0xe1b   :  { %2035 = vsyncpa [#allocation14], 1 }
 0xe1c   :  { %2036 = vsyncpa [#allocation17], 1 }

</bundles_post_ra>
